<compile_context>
chip_gen: v6e
topology: v6e:2x2x1
jax: 0.10.0
libtpu: 0.0.40
codegen_flags: <defaults>
</compile_context>

<pallas_src>
import functools

import jax
import jax.numpy as jnp
from jax.experimental import pallas as pl
from jax.experimental.pallas import tpu as pltpu


# ----------------------------- configuration --------------------------------
DIM = 32                 # C
NUM_HEADS = 4
WIN_SIZE = (4, 4)        # (Wh, Ww)
N_TOK = WIN_SIZE[0] * WIN_SIZE[1]     # tokens per window
HEAD_DIM = DIM // NUM_HEADS
SCALE = HEAD_DIM ** (-0.5)
B_WINDOWS = 8            # B_ = batch * num_windows


def _windows_per_block(b_, n_tok):
    """Batch as many windows per grid step as sensible (fill the MXU row dim)
    while keeping >= 2 parallel steps so v7x's two TensorCores both get work."""
    target_rows = 256
    w = max(1, min(b_, target_rows // n_tok))
    while b_ % w:
        w -= 1
    if w == b_ and b_ % 2 == 0:
        w = b_ // 2
    return w


# ------------------------------ Pallas kernel --------------------------------
def _window_attention_kernel(
    x_ref,       # (W*N, C)        bf16  tokens of W windows
    wqkv_ref,    # (C, 3C)         bf16  fused [Wq*scale | Wk | Wv] (in, out)
    bqkv_ref,    # (1, 3C)         f32   fused [bq*scale | bk | bv]
    rpb_ref,     # (N, H*N)        f32   lane-packed relative position bias
    wp_ref,      # (H, hd, C)      bf16  proj weight, pre-split per head
    bp_ref,      # (1, C)          f32   proj bias
    o_ref,       # (W*N, C)        f32   output
    *,
    num_heads,
    head_dim,
    n_tok,
    n_windows,
):
    c = num_heads * head_dim

    # Fused q/k/v projection: one wide MXU push over the whole window block.
    qkv = jnp.dot(x_ref[...], wqkv_ref[...],
                  preferred_element_type=jnp.float32) + bqkv_ref[...]   # (W*N, 3C) f32

    rpb = rpb_ref[...]                                                  # (N, H*N)

    out_acc = None
    for h in range(num_heads):                                          # static 4-way unroll
        lo, hi = h * head_dim, (h + 1) * head_dim
        qh = qkv[:, lo:hi].reshape(n_windows, n_tok, head_dim).astype(jnp.bfloat16)
        kh = qkv[:, c + lo:c + hi].reshape(n_windows, n_tok, head_dim).astype(jnp.bfloat16)
        vh = qkv[:, 2 * c + lo:2 * c + hi].reshape(n_windows, n_tok, head_dim).astype(jnp.bfloat16)

        # scores: contract last dims, batched over windows (no explicit k.T relayout)
        s = jnp.einsum("wnd,wmd->wnm", qh, kh,
                       preferred_element_type=jnp.float32)              # (W, N, N)
        s = s + rpb[:, h * n_tok:(h + 1) * n_tok][None]                 # rel-pos bias

        # softmax over keys (f32); denominator via EUP approx reciprocal
        s = s - jnp.max(s, axis=-1, keepdims=True)
        p = jnp.exp(s)
        p = p * pl.reciprocal(jnp.sum(p, axis=-1, keepdims=True), approx=True)

        oh = jnp.einsum("wnm,wmd->wnd", p.astype(jnp.bfloat16), vh,
                        preferred_element_type=jnp.float32)             # (W, N, hd)

        # Fold the head concat into the output projection:
        #   concat_h(O_h) @ Wp == sum_h O_h @ Wp[h*hd:(h+1)*hd, :]
        contrib = jnp.dot(
            oh.reshape(n_windows * n_tok, head_dim).astype(jnp.bfloat16),
            wp_ref[h],
            preferred_element_type=jnp.float32)                         # (W*N, C)
        out_acc = contrib if out_acc is None else out_acc + contrib

    o_ref[...] = (out_acc + bp_ref[...]).astype(o_ref.dtype)


# ------------------------------- wrapper --------------------------------------
def window_attention(x, params, rel_pos_bias, *, num_heads=NUM_HEADS):
    """x: (B_, N, C) float32. rel_pos_bias: (num_heads, N, N) float32."""
    b_, n, c = x.shape
    head_dim = c // num_heads
    scale = head_dim ** (-0.5)

    # Fold the qk scale into the q projection and fuse q|kv into one weight.
    wqkv = jnp.concatenate([params["wq"] * scale, params["wkv"]], axis=1)   # (C, 3C)
    bqkv = jnp.concatenate([params["bq"] * scale, params["bkv"]], axis=1)   # (1, 3C)

    # Lane-pack the relative position bias: (H, N, N) -> (N, H*N).
    rpb_packed = rel_pos_bias.transpose(1, 0, 2).reshape(n, num_heads * n)

    # bf16 operands for the MXU (accumulation stays f32 inside the kernel).
    x2d = x.reshape(b_ * n, c).astype(jnp.bfloat16)
    wqkv16 = wqkv.astype(jnp.bfloat16)
    wp3 = params["wp"].reshape(num_heads, head_dim, c).astype(jnp.bfloat16)

    w_blk = _windows_per_block(b_, n)
    grid = (b_ // w_blk,)
    rows = w_blk * n

    kernel = functools.partial(
        _window_attention_kernel,
        num_heads=num_heads, head_dim=head_dim, n_tok=n, n_windows=w_blk)

    full2d = lambda shape: pl.BlockSpec(shape, lambda b: (0, 0))

    out2d = pl.pallas_call(
        kernel,
        out_shape=jax.ShapeDtypeStruct((b_ * n, c), jnp.float32),
        grid_spec=pltpu.PrefetchScalarGridSpec(
            num_scalar_prefetch=0,
            grid=grid,
            in_specs=[
                pl.BlockSpec((rows, c), lambda b: (b, 0)),                    # x block
                full2d((c, 3 * c)),                                           # Wqkv
                full2d((1, 3 * c)),                                           # bqkv
                full2d((n, num_heads * n)),                                   # rel-pos bias
                pl.BlockSpec((num_heads, head_dim, c), lambda b: (0, 0, 0)),  # Wp per head
                full2d((1, c)),                                               # bp
            ],
            out_specs=pl.BlockSpec((rows, c), lambda b: (b, 0)),
        ),
        compiler_params=pltpu.CompilerParams(
            dimension_semantics=("parallel",),
        ),
    )(x2d, wqkv16, bqkv, rpb_packed, wp3, params["bp"])

    return out2d.reshape(b_, n, c)


# ---------------------- glue: params & relative-position bias -----------------
def make_params(key, dim=DIM, num_heads=NUM_HEADS, win_size=WIN_SIZE):
    """Deterministic synthetic parameters (weights stored as (in, out))."""
    ks = jax.random.split(key, 8)
    table_size = (2 * win_size[0] - 1) * (2 * win_size[1] - 1)
    init = lambda k, shape, s: (jax.random.normal(k, shape, jnp.float32) * s)
    return {
        "wq": init(ks[0], (dim, dim), 0.05),
        "bq": init(ks[1], (1, dim), 0.05),
        "wkv": init(ks[2], (dim, 2 * dim), 0.05),
        "bkv": init(ks[3], (1, 2 * dim), 0.05),
        # trunc_normal_(std=0.02) approximated by clipped normal
        "rpb_table": jnp.clip(
            jax.random.normal(ks[4], (table_size, num_heads), jnp.float32) * 0.02,
            -0.04, 0.04),
        "wp": init(ks[5], (dim, dim), 0.05),
        "bp": init(ks[6], (1, dim), 0.05),
    }


def make_relative_position_bias(rpb_table, win_size=WIN_SIZE, num_heads=NUM_HEADS):
    wh, ww = win_size
    coords_h = jnp.arange(wh)
    coords_w = jnp.arange(ww)
    coords = jnp.stack(jnp.meshgrid(coords_h, coords_w, indexing="ij"))  # (2, Wh, Ww)
    coords_flatten = coords.reshape(2, -1)                               # (2, N)
    rel = coords_flatten[:, :, None] - coords_flatten[:, None, :]        # (2, N, N)
    rel = rel.transpose(1, 2, 0)                                         # (N, N, 2)
    rel = rel.at[:, :, 0].add(wh - 1)
    rel = rel.at[:, :, 1].add(ww - 1)
    rel = rel.at[:, :, 0].multiply(2 * ww - 1)
    rel_index = rel.sum(-1)                                              # (N, N)
    n = wh * ww
    bias = rpb_table[rel_index.reshape(-1)].reshape(n, n, num_heads)
    return bias.transpose(2, 0, 1)                                       # (nH, N, N)


# ----------------------------- pure-JAX reference ------------------------------
def window_attention_ref(x, params, rel_pos_bias, *, num_heads=NUM_HEADS):
    b_, n, c = x.shape
    hd = c // num_heads
    scale = hd ** (-0.5)

    q = x @ params["wq"] + params["bq"]                  # (B, N, C)
    kv = x @ params["wkv"] + params["bkv"]               # (B, N, 2C)
    k, v = kv[..., :c], kv[..., c:]

    def split_heads(t):  # (B, N, C) -> (B, H, N, hd)
        return t.reshape(b_, n, num_heads, hd).transpose(0, 2, 1, 3)

    qh, kh, vh = split_heads(q) * scale, split_heads(k), split_heads(v)
    attn = jnp.einsum("bhnd,bhmd->bhnm", qh, kh) + rel_pos_bias[None]
    attn = jax.nn.softmax(attn, axis=-1)
    out = jnp.einsum("bhnm,bhmd->bhnd", attn, vh)
    out = out.transpose(0, 2, 1, 3).reshape(b_, n, c)
    return out @ params["wp"] + params["bp"]


# ------------------------------------ main -------------------------------------
if __name__ == "__main__":
    key = jax.random.PRNGKey(0)
    k_x, k_p = jax.random.split(key)

    x = jax.random.normal(k_x, (B_WINDOWS, N_TOK, DIM), jnp.float32)
    params = make_params(k_p)
    rel_pos_bias = make_relative_position_bias(params["rpb_table"])

    out = jax.block_until_ready(window_attention(x, params, rel_pos_bias))
    ref = window_attention_ref(x, params, rel_pos_bias)

    assert out.shape == (B_WINDOWS, N_TOK, DIM)
    # bf16 MXU operands + approx reciprocal -> looser tolerance than pure f32.
    assert jnp.allclose(out, ref, rtol=1e-2, atol=1e-2), "mismatch vs reference"

    print("KERNEL_OK")
</pallas_src>

<mosaic_0001>
module attributes {stable_mosaic.version = 11 : i64} {
  func.func @_window_attention_kernel(%arg0: i32, %arg1: memref<64x32xbf16, #tpu.memory_space<vmem>>, %arg2: memref<32x96xbf16, #tpu.memory_space<vmem>>, %arg3: memref<1x96xf32, #tpu.memory_space<vmem>>, %arg4: memref<16x64xf32, #tpu.memory_space<vmem>>, %arg5: memref<4x8x32xbf16, #tpu.memory_space<vmem>>, %arg6: memref<1x32xf32, #tpu.memory_space<vmem>>, %arg7: memref<64x32xf32, #tpu.memory_space<vmem>>) attributes {dimension_semantics = [#tpu.dimension_semantics<parallel>], iteration_bounds = array<i64: 2>, scalar_prefetch = 0 : i64, scratch_operands = 0 : i64, tpu.core_type = #tpu.core_type<tc>, window_params = [{transform_indices = @transform_0, window_bounds = array<i64: 64, 32>}, {pipeline_mode = #tpu.pipeline_mode<synchronous>, transform_indices = @transform_1, window_bounds = array<i64: 32, 96>}, {pipeline_mode = #tpu.pipeline_mode<synchronous>, transform_indices = @transform_2, window_bounds = array<i64: 1, 96>}, {pipeline_mode = #tpu.pipeline_mode<synchronous>, transform_indices = @transform_3, window_bounds = array<i64: 16, 64>}, {pipeline_mode = #tpu.pipeline_mode<synchronous>, transform_indices = @transform_4, window_bounds = array<i64: 4, 8, 32>}, {pipeline_mode = #tpu.pipeline_mode<synchronous>, transform_indices = @transform_5, window_bounds = array<i64: 1, 32>}, {transform_indices = @transform_6, window_bounds = array<i64: 64, 32>}]} {
    %c0 = arith.constant 0 : index
    %c0_0 = arith.constant 0 : index
    %0 = vector.load %arg1[%c0, %c0_0] : memref<64x32xbf16, #tpu.memory_space<vmem>>, vector<64x32xbf16>
    %c0_1 = arith.constant 0 : index
    %c0_2 = arith.constant 0 : index
    %1 = vector.load %arg2[%c0_1, %c0_2] : memref<32x96xbf16, #tpu.memory_space<vmem>>, vector<32x96xbf16>
    %cst = arith.constant dense<0.000000e+00> : vector<64x96xf32>
    %2 = tpu.matmul %0, %1, %cst {dimension_numbers = #tpu.dot_dimension_numbers<[1], [0], [0], [1], [0, 0, 1, 1], [], []>} : vector<64x32xbf16>, vector<32x96xbf16>, vector<64x96xf32> -> vector<64x96xf32>
    %c0_3 = arith.constant 0 : index
    %c0_4 = arith.constant 0 : index
    %3 = vector.load %arg3[%c0_3, %c0_4] : memref<1x96xf32, #tpu.memory_space<vmem>>, vector<1x96xf32>
    %4 = vector.broadcast %3 : vector<1x96xf32> to vector<64x96xf32>
    %5 = arith.addf %2, %4 : vector<64x96xf32>
    %c0_5 = arith.constant 0 : index
    %c0_6 = arith.constant 0 : index
    %6 = vector.load %arg4[%c0_5, %c0_6] : memref<16x64xf32, #tpu.memory_space<vmem>>, vector<16x64xf32>
    %7 = vector.extract_strided_slice %5 {offsets = [0, 0], sizes = [64, 8], strides = [1, 1]} : vector<64x96xf32> to vector<64x8xf32>
    %8 = vector.shape_cast %7 : vector<64x8xf32> to vector<4x16x8xf32>
    %9 = arith.truncf %8 : vector<4x16x8xf32> to vector<4x16x8xbf16>
    %10 = vector.extract_strided_slice %5 {offsets = [0, 32], sizes = [64, 8], strides = [1, 1]} : vector<64x96xf32> to vector<64x8xf32>
    %11 = vector.shape_cast %10 : vector<64x8xf32> to vector<4x16x8xf32>
    %12 = arith.truncf %11 : vector<4x16x8xf32> to vector<4x16x8xbf16>
    %13 = vector.extract_strided_slice %5 {offsets = [0, 64], sizes = [64, 8], strides = [1, 1]} : vector<64x96xf32> to vector<64x8xf32>
    %14 = vector.shape_cast %13 : vector<64x8xf32> to vector<4x16x8xf32>
    %15 = arith.truncf %14 : vector<4x16x8xf32> to vector<4x16x8xbf16>
    "tpu.trace_start"() <{level = 10 : i32, message = "wnd,wmd->wnm"}> : () -> ()
    %cst_7 = arith.constant dense<0.000000e+00> : vector<4x16x16xf32>
    %16 = tpu.matmul %9, %12, %cst_7 {dimension_numbers = #tpu.dot_dimension_numbers<[2], [2], [1], [1], [0, 0, 0, 1, 1, 1], [0], [0]>} : vector<4x16x8xbf16>, vector<4x16x8xbf16>, vector<4x16x16xf32> -> vector<4x16x16xf32>
    "tpu.trace_stop"() : () -> ()
    %17 = vector.extract_strided_slice %6 {offsets = [0, 0], sizes = [16, 16], strides = [1, 1]} : vector<16x64xf32> to vector<16x16xf32>
    %18 = vector.shape_cast %17 : vector<16x16xf32> to vector<1x16x16xf32>
    %19 = vector.broadcast %18 : vector<1x16x16xf32> to vector<4x16x16xf32>
    %20 = arith.addf %16, %19 : vector<4x16x16xf32>
    %cst_8 = arith.constant dense<0xFF800000> : vector<4x16xf32>
    %21 = vector.multi_reduction <maximumf>, %20, %cst_8 [2] : vector<4x16x16xf32> to vector<4x16xf32>
    %22 = vector.shape_cast %21 : vector<4x16xf32> to vector<4x16x1xf32>
    %23 = vector.broadcast %22 : vector<4x16x1xf32> to vector<4x16x16xf32>
    %24 = arith.subf %20, %23 : vector<4x16x16xf32>
    %25 = math.exp %24 : vector<4x16x16xf32>
    %cst_9 = arith.constant dense<0.000000e+00> : vector<4x16xf32>
    %26 = vector.multi_reduction <add>, %25, %cst_9 [2] : vector<4x16x16xf32> to vector<4x16xf32>
    %27 = vector.shape_cast %26 : vector<4x16xf32> to vector<4x16x1xf32>
    %28 = tpu.reciprocal %27 {approx = true} : vector<4x16x1xf32> -> vector<4x16x1xf32>
    %29 = vector.broadcast %28 : vector<4x16x1xf32> to vector<4x16x16xf32>
    %30 = arith.mulf %25, %29 : vector<4x16x16xf32>
    %31 = arith.truncf %30 : vector<4x16x16xf32> to vector<4x16x16xbf16>
    "tpu.trace_start"() <{level = 10 : i32, message = "wnm,wmd->wnd"}> : () -> ()
    %cst_10 = arith.constant dense<0.000000e+00> : vector<4x16x8xf32>
    %32 = tpu.matmul %31, %15, %cst_10 {dimension_numbers = #tpu.dot_dimension_numbers<[2], [1], [1], [2], [0, 0, 0, 1, 1, 2], [0], [0]>} : vector<4x16x16xbf16>, vector<4x16x8xbf16>, vector<4x16x8xf32> -> vector<4x16x8xf32>
    "tpu.trace_stop"() : () -> ()
    %33 = vector.shape_cast %32 : vector<4x16x8xf32> to vector<64x8xf32>
    %34 = arith.truncf %33 : vector<64x8xf32> to vector<64x8xbf16>
    %c0_11 = arith.constant 0 : index
    %c0_12 = arith.constant 0 : index
    %c0_13 = arith.constant 0 : index
    %35 = vector.load %arg5[%c0_11, %c0_12, %c0_13] : memref<4x8x32xbf16, #tpu.memory_space<vmem>>, vector<1x8x32xbf16>
    %36 = vector.shape_cast %35 : vector<1x8x32xbf16> to vector<8x32xbf16>
    %cst_14 = arith.constant dense<0.000000e+00> : vector<64x32xf32>
    %37 = tpu.matmul %34, %36, %cst_14 {dimension_numbers = #tpu.dot_dimension_numbers<[1], [0], [0], [1], [0, 0, 1, 1], [], []>} : vector<64x8xbf16>, vector<8x32xbf16>, vector<64x32xf32> -> vector<64x32xf32>
    %38 = vector.extract_strided_slice %5 {offsets = [0, 8], sizes = [64, 8], strides = [1, 1]} : vector<64x96xf32> to vector<64x8xf32>
    %39 = vector.shape_cast %38 : vector<64x8xf32> to vector<4x16x8xf32>
    %40 = arith.truncf %39 : vector<4x16x8xf32> to vector<4x16x8xbf16>
    %41 = vector.extract_strided_slice %5 {offsets = [0, 40], sizes = [64, 8], strides = [1, 1]} : vector<64x96xf32> to vector<64x8xf32>
    %42 = vector.shape_cast %41 : vector<64x8xf32> to vector<4x16x8xf32>
    %43 = arith.truncf %42 : vector<4x16x8xf32> to vector<4x16x8xbf16>
    %44 = vector.extract_strided_slice %5 {offsets = [0, 72], sizes = [64, 8], strides = [1, 1]} : vector<64x96xf32> to vector<64x8xf32>
    %45 = vector.shape_cast %44 : vector<64x8xf32> to vector<4x16x8xf32>
    %46 = arith.truncf %45 : vector<4x16x8xf32> to vector<4x16x8xbf16>
    "tpu.trace_start"() <{level = 10 : i32, message = "wnd,wmd->wnm"}> : () -> ()
    %cst_15 = arith.constant dense<0.000000e+00> : vector<4x16x16xf32>
    %47 = tpu.matmul %40, %43, %cst_15 {dimension_numbers = #tpu.dot_dimension_numbers<[2], [2], [1], [1], [0, 0, 0, 1, 1, 1], [0], [0]>} : vector<4x16x8xbf16>, vector<4x16x8xbf16>, vector<4x16x16xf32> -> vector<4x16x16xf32>
    "tpu.trace_stop"() : () -> ()
    %48 = vector.extract_strided_slice %6 {offsets = [0, 16], sizes = [16, 16], strides = [1, 1]} : vector<16x64xf32> to vector<16x16xf32>
    %49 = vector.shape_cast %48 : vector<16x16xf32> to vector<1x16x16xf32>
    %50 = vector.broadcast %49 : vector<1x16x16xf32> to vector<4x16x16xf32>
    %51 = arith.addf %47, %50 : vector<4x16x16xf32>
    %cst_16 = arith.constant dense<0xFF800000> : vector<4x16xf32>
    %52 = vector.multi_reduction <maximumf>, %51, %cst_16 [2] : vector<4x16x16xf32> to vector<4x16xf32>
    %53 = vector.shape_cast %52 : vector<4x16xf32> to vector<4x16x1xf32>
    %54 = vector.broadcast %53 : vector<4x16x1xf32> to vector<4x16x16xf32>
    %55 = arith.subf %51, %54 : vector<4x16x16xf32>
    %56 = math.exp %55 : vector<4x16x16xf32>
    %cst_17 = arith.constant dense<0.000000e+00> : vector<4x16xf32>
    %57 = vector.multi_reduction <add>, %56, %cst_17 [2] : vector<4x16x16xf32> to vector<4x16xf32>
    %58 = vector.shape_cast %57 : vector<4x16xf32> to vector<4x16x1xf32>
    %59 = tpu.reciprocal %58 {approx = true} : vector<4x16x1xf32> -> vector<4x16x1xf32>
    %60 = vector.broadcast %59 : vector<4x16x1xf32> to vector<4x16x16xf32>
    %61 = arith.mulf %56, %60 : vector<4x16x16xf32>
    %62 = arith.truncf %61 : vector<4x16x16xf32> to vector<4x16x16xbf16>
    "tpu.trace_start"() <{level = 10 : i32, message = "wnm,wmd->wnd"}> : () -> ()
    %cst_18 = arith.constant dense<0.000000e+00> : vector<4x16x8xf32>
    %63 = tpu.matmul %62, %46, %cst_18 {dimension_numbers = #tpu.dot_dimension_numbers<[2], [1], [1], [2], [0, 0, 0, 1, 1, 2], [0], [0]>} : vector<4x16x16xbf16>, vector<4x16x8xbf16>, vector<4x16x8xf32> -> vector<4x16x8xf32>
    "tpu.trace_stop"() : () -> ()
    %64 = vector.shape_cast %63 : vector<4x16x8xf32> to vector<64x8xf32>
    %65 = arith.truncf %64 : vector<64x8xf32> to vector<64x8xbf16>
    %c1 = arith.constant 1 : index
    %c0_19 = arith.constant 0 : index
    %c0_20 = arith.constant 0 : index
    %66 = vector.load %arg5[%c1, %c0_19, %c0_20] : memref<4x8x32xbf16, #tpu.memory_space<vmem>>, vector<1x8x32xbf16>
    %67 = vector.shape_cast %66 : vector<1x8x32xbf16> to vector<8x32xbf16>
    %cst_21 = arith.constant dense<0.000000e+00> : vector<64x32xf32>
    %68 = tpu.matmul %65, %67, %cst_21 {dimension_numbers = #tpu.dot_dimension_numbers<[1], [0], [0], [1], [0, 0, 1, 1], [], []>} : vector<64x8xbf16>, vector<8x32xbf16>, vector<64x32xf32> -> vector<64x32xf32>
    %69 = arith.addf %37, %68 : vector<64x32xf32>
    %70 = vector.extract_strided_slice %5 {offsets = [0, 16], sizes = [64, 8], strides = [1, 1]} : vector<64x96xf32> to vector<64x8xf32>
    %71 = vector.shape_cast %70 : vector<64x8xf32> to vector<4x16x8xf32>
    %72 = arith.truncf %71 : vector<4x16x8xf32> to vector<4x16x8xbf16>
    %73 = vector.extract_strided_slice %5 {offsets = [0, 48], sizes = [64, 8], strides = [1, 1]} : vector<64x96xf32> to vector<64x8xf32>
    %74 = vector.shape_cast %73 : vector<64x8xf32> to vector<4x16x8xf32>
    %75 = arith.truncf %74 : vector<4x16x8xf32> to vector<4x16x8xbf16>
    %76 = vector.extract_strided_slice %5 {offsets = [0, 80], sizes = [64, 8], strides = [1, 1]} : vector<64x96xf32> to vector<64x8xf32>
    %77 = vector.shape_cast %76 : vector<64x8xf32> to vector<4x16x8xf32>
    %78 = arith.truncf %77 : vector<4x16x8xf32> to vector<4x16x8xbf16>
    "tpu.trace_start"() <{level = 10 : i32, message = "wnd,wmd->wnm"}> : () -> ()
    %cst_22 = arith.constant dense<0.000000e+00> : vector<4x16x16xf32>
    %79 = tpu.matmul %72, %75, %cst_22 {dimension_numbers = #tpu.dot_dimension_numbers<[2], [2], [1], [1], [0, 0, 0, 1, 1, 1], [0], [0]>} : vector<4x16x8xbf16>, vector<4x16x8xbf16>, vector<4x16x16xf32> -> vector<4x16x16xf32>
    "tpu.trace_stop"() : () -> ()
    %80 = vector.extract_strided_slice %6 {offsets = [0, 32], sizes = [16, 16], strides = [1, 1]} : vector<16x64xf32> to vector<16x16xf32>
    %81 = vector.shape_cast %80 : vector<16x16xf32> to vector<1x16x16xf32>
    %82 = vector.broadcast %81 : vector<1x16x16xf32> to vector<4x16x16xf32>
    %83 = arith.addf %79, %82 : vector<4x16x16xf32>
    %cst_23 = arith.constant dense<0xFF800000> : vector<4x16xf32>
    %84 = vector.multi_reduction <maximumf>, %83, %cst_23 [2] : vector<4x16x16xf32> to vector<4x16xf32>
    %85 = vector.shape_cast %84 : vector<4x16xf32> to vector<4x16x1xf32>
    %86 = vector.broadcast %85 : vector<4x16x1xf32> to vector<4x16x16xf32>
    %87 = arith.subf %83, %86 : vector<4x16x16xf32>
    %88 = math.exp %87 : vector<4x16x16xf32>
    %cst_24 = arith.constant dense<0.000000e+00> : vector<4x16xf32>
    %89 = vector.multi_reduction <add>, %88, %cst_24 [2] : vector<4x16x16xf32> to vector<4x16xf32>
    %90 = vector.shape_cast %89 : vector<4x16xf32> to vector<4x16x1xf32>
    %91 = tpu.reciprocal %90 {approx = true} : vector<4x16x1xf32> -> vector<4x16x1xf32>
    %92 = vector.broadcast %91 : vector<4x16x1xf32> to vector<4x16x16xf32>
    %93 = arith.mulf %88, %92 : vector<4x16x16xf32>
    %94 = arith.truncf %93 : vector<4x16x16xf32> to vector<4x16x16xbf16>
    "tpu.trace_start"() <{level = 10 : i32, message = "wnm,wmd->wnd"}> : () -> ()
    %cst_25 = arith.constant dense<0.000000e+00> : vector<4x16x8xf32>
    %95 = tpu.matmul %94, %78, %cst_25 {dimension_numbers = #tpu.dot_dimension_numbers<[2], [1], [1], [2], [0, 0, 0, 1, 1, 2], [0], [0]>} : vector<4x16x16xbf16>, vector<4x16x8xbf16>, vector<4x16x8xf32> -> vector<4x16x8xf32>
    "tpu.trace_stop"() : () -> ()
    %96 = vector.shape_cast %95 : vector<4x16x8xf32> to vector<64x8xf32>
    %97 = arith.truncf %96 : vector<64x8xf32> to vector<64x8xbf16>
    %c2 = arith.constant 2 : index
    %c0_26 = arith.constant 0 : index
    %c0_27 = arith.constant 0 : index
    %98 = vector.load %arg5[%c2, %c0_26, %c0_27] : memref<4x8x32xbf16, #tpu.memory_space<vmem>>, vector<1x8x32xbf16>
    %99 = vector.shape_cast %98 : vector<1x8x32xbf16> to vector<8x32xbf16>
    %cst_28 = arith.constant dense<0.000000e+00> : vector<64x32xf32>
    %100 = tpu.matmul %97, %99, %cst_28 {dimension_numbers = #tpu.dot_dimension_numbers<[1], [0], [0], [1], [0, 0, 1, 1], [], []>} : vector<64x8xbf16>, vector<8x32xbf16>, vector<64x32xf32> -> vector<64x32xf32>
    %101 = arith.addf %69, %100 : vector<64x32xf32>
    %102 = vector.extract_strided_slice %5 {offsets = [0, 24], sizes = [64, 8], strides = [1, 1]} : vector<64x96xf32> to vector<64x8xf32>
    %103 = vector.shape_cast %102 : vector<64x8xf32> to vector<4x16x8xf32>
    %104 = arith.truncf %103 : vector<4x16x8xf32> to vector<4x16x8xbf16>
    %105 = vector.extract_strided_slice %5 {offsets = [0, 56], sizes = [64, 8], strides = [1, 1]} : vector<64x96xf32> to vector<64x8xf32>
    %106 = vector.shape_cast %105 : vector<64x8xf32> to vector<4x16x8xf32>
    %107 = arith.truncf %106 : vector<4x16x8xf32> to vector<4x16x8xbf16>
    %108 = vector.extract_strided_slice %5 {offsets = [0, 88], sizes = [64, 8], strides = [1, 1]} : vector<64x96xf32> to vector<64x8xf32>
    %109 = vector.shape_cast %108 : vector<64x8xf32> to vector<4x16x8xf32>
    %110 = arith.truncf %109 : vector<4x16x8xf32> to vector<4x16x8xbf16>
    "tpu.trace_start"() <{level = 10 : i32, message = "wnd,wmd->wnm"}> : () -> ()
    %cst_29 = arith.constant dense<0.000000e+00> : vector<4x16x16xf32>
    %111 = tpu.matmul %104, %107, %cst_29 {dimension_numbers = #tpu.dot_dimension_numbers<[2], [2], [1], [1], [0, 0, 0, 1, 1, 1], [0], [0]>} : vector<4x16x8xbf16>, vector<4x16x8xbf16>, vector<4x16x16xf32> -> vector<4x16x16xf32>
    "tpu.trace_stop"() : () -> ()
    %112 = vector.extract_strided_slice %6 {offsets = [0, 48], sizes = [16, 16], strides = [1, 1]} : vector<16x64xf32> to vector<16x16xf32>
    %113 = vector.shape_cast %112 : vector<16x16xf32> to vector<1x16x16xf32>
    %114 = vector.broadcast %113 : vector<1x16x16xf32> to vector<4x16x16xf32>
    %115 = arith.addf %111, %114 : vector<4x16x16xf32>
    %cst_30 = arith.constant dense<0xFF800000> : vector<4x16xf32>
    %116 = vector.multi_reduction <maximumf>, %115, %cst_30 [2] : vector<4x16x16xf32> to vector<4x16xf32>
    %117 = vector.shape_cast %116 : vector<4x16xf32> to vector<4x16x1xf32>
    %118 = vector.broadcast %117 : vector<4x16x1xf32> to vector<4x16x16xf32>
    %119 = arith.subf %115, %118 : vector<4x16x16xf32>
    %120 = math.exp %119 : vector<4x16x16xf32>
    %cst_31 = arith.constant dense<0.000000e+00> : vector<4x16xf32>
    %121 = vector.multi_reduction <add>, %120, %cst_31 [2] : vector<4x16x16xf32> to vector<4x16xf32>
    %122 = vector.shape_cast %121 : vector<4x16xf32> to vector<4x16x1xf32>
    %123 = tpu.reciprocal %122 {approx = true} : vector<4x16x1xf32> -> vector<4x16x1xf32>
    %124 = vector.broadcast %123 : vector<4x16x1xf32> to vector<4x16x16xf32>
    %125 = arith.mulf %120, %124 : vector<4x16x16xf32>
    %126 = arith.truncf %125 : vector<4x16x16xf32> to vector<4x16x16xbf16>
    "tpu.trace_start"() <{level = 10 : i32, message = "wnm,wmd->wnd"}> : () -> ()
    %cst_32 = arith.constant dense<0.000000e+00> : vector<4x16x8xf32>
    %127 = tpu.matmul %126, %110, %cst_32 {dimension_numbers = #tpu.dot_dimension_numbers<[2], [1], [1], [2], [0, 0, 0, 1, 1, 2], [0], [0]>} : vector<4x16x16xbf16>, vector<4x16x8xbf16>, vector<4x16x8xf32> -> vector<4x16x8xf32>
    "tpu.trace_stop"() : () -> ()
    %128 = vector.shape_cast %127 : vector<4x16x8xf32> to vector<64x8xf32>
    %129 = arith.truncf %128 : vector<64x8xf32> to vector<64x8xbf16>
    %c3 = arith.constant 3 : index
    %c0_33 = arith.constant 0 : index
    %c0_34 = arith.constant 0 : index
    %130 = vector.load %arg5[%c3, %c0_33, %c0_34] : memref<4x8x32xbf16, #tpu.memory_space<vmem>>, vector<1x8x32xbf16>
    %131 = vector.shape_cast %130 : vector<1x8x32xbf16> to vector<8x32xbf16>
    %cst_35 = arith.constant dense<0.000000e+00> : vector<64x32xf32>
    %132 = tpu.matmul %129, %131, %cst_35 {dimension_numbers = #tpu.dot_dimension_numbers<[1], [0], [0], [1], [0, 0, 1, 1], [], []>} : vector<64x8xbf16>, vector<8x32xbf16>, vector<64x32xf32> -> vector<64x32xf32>
    %133 = arith.addf %101, %132 : vector<64x32xf32>
    %c0_36 = arith.constant 0 : index
    %c0_37 = arith.constant 0 : index
    %134 = vector.load %arg6[%c0_36, %c0_37] : memref<1x32xf32, #tpu.memory_space<vmem>>, vector<1x32xf32>
    %135 = vector.broadcast %134 : vector<1x32xf32> to vector<64x32xf32>
    %136 = arith.addf %133, %135 : vector<64x32xf32>
    %c0_38 = arith.constant 0 : index
    %c0_39 = arith.constant 0 : index
    %137 = vector.load %arg7[%c0_38, %c0_39] : memref<64x32xf32, #tpu.memory_space<vmem>>, vector<64x32xf32>
    tpu.vector_store %arg7[%c0_38, %c0_39], %136 {strides = array<i32>} : memref<64x32xf32, #tpu.memory_space<vmem>>, vector<64x32xf32>,
    return
  }
  func.func @transform_0(%arg0: i32) -> (i32, i32) {
    %c0_i32 = arith.constant 0 : i32
    %c0_i32_0 = arith.constant 0 : i32
    return %arg0, %c0_i32 : i32, i32
  }
  func.func @transform_1(%arg0: i32) -> (i32, i32) {
    %c0_i32 = arith.constant 0 : i32
    %c0_i32_0 = arith.constant 0 : i32
    %c0_i32_1 = arith.constant 0 : i32
    return %c0_i32, %c0_i32_0 : i32, i32
  }
  func.func @transform_2(%arg0: i32) -> (i32, i32) {
    %c0_i32 = arith.constant 0 : i32
    %c0_i32_0 = arith.constant 0 : i32
    %c0_i32_1 = arith.constant 0 : i32
    return %c0_i32, %c0_i32_0 : i32, i32
  }
  func.func @transform_3(%arg0: i32) -> (i32, i32) {
    %c0_i32 = arith.constant 0 : i32
    %c0_i32_0 = arith.constant 0 : i32
    %c0_i32_1 = arith.constant 0 : i32
    return %c0_i32, %c0_i32_0 : i32, i32
  }
  func.func @transform_4(%arg0: i32) -> (i32, i32, i32) {
    %c0_i32 = arith.constant 0 : i32
    %c0_i32_0 = arith.constant 0 : i32
    %c0_i32_1 = arith.constant 0 : i32
    %c0_i32_2 = arith.constant 0 : i32
    return %c0_i32, %c0_i32_0, %c0_i32_1 : i32, i32, i32
  }
  func.func @transform_5(%arg0: i32) -> (i32, i32) {
    %c0_i32 = arith.constant 0 : i32
    %c0_i32_0 = arith.constant 0 : i32
    %c0_i32_1 = arith.constant 0 : i32
    return %c0_i32, %c0_i32_0 : i32, i32
  }
  func.func @transform_6(%arg0: i32) -> (i32, i32) {
    %c0_i32 = arith.constant 0 : i32
    %c0_i32_0 = arith.constant 0 : i32
    return %arg0, %c0_i32 : i32, i32
  }
}

</mosaic_0001>

<bundles_post_ra>
// kernel: tpu_custom_call.1
= control target key start
LH: loop header
LB: loop body
LE: loop exit
PB: predicated region body
PF: predicated region fallthrough
CT: control target
= control target key end

     0   :  { %s3413_s21 = smov 0   ;;  %s4024_s0 = inlined_call_operand.vmem [shape: bf16[128,32], index: 0, kind: input, shape index: {}]   ;;  %s4025_s1 = inlined_call_operand.vmem [shape: bf16[32,96], index: 1, kind: input, shape index: {}]   ;;  %s4026_s2 = inlined_call_operand.vmem [shape: f32[1,96], index: 2, kind: input, shape index: {}]   ;;  %s4027_s3 = inlined_call_operand.vmem [shape: f32[16,64], index: 3, kind: input, shape index: {}]   ;;  %s4028_s4 = inlined_call_operand.vmem [shape: bf16[4,8,32], index: 4, kind: input, shape index: {}]   ;;  %s4029_s5 = inlined_call_operand.vmem [shape: f32[1,32], index: 5, kind: input, shape index: {}]   ;;  %s4030_s6 = inlined_call_operand.vmem [shape: f32[128,32], index: 6, kind: output, shape index: {}]  }
   0x1 LB: > { %s2784_s22 = sadd.s32 4294967295, %s3363_s21   ;;  %p2788_p0 = scmp.ge.s32.totalorder %s3363_s21, 1  ;;  %s3363_s21 = sphi %s3413_s21, %s16_s21  }
   0x2   : > { %p213_p1 = scmp.lt.s32.totalorder %s3363_s21, 3 }
   0x4   : > { %p214_p2 = pnand %p2788_p0, %p213_p1 }
   0x5   : > { %s2789_s25 = sshll.u32 (!%p214_p2), %s2784_s22, 3  ;;  %s3367_s10 = smov (!%p214_p2), 96  }
   0x6   : > { %217 = sbr.rel (%p214_p2) target bundleno = 3425 (0xd61), region = 44  ;;  %p244_p3 = scmp.lt.s32.totalorder (!%p214_p2), %s2789_s25, 15 }
   0x7   : > { %s3368_s15 = smov (!%p214_p2), 64   ;;  %s3369_s16 = smov (!%p214_p2), 88  }
   0x8   : > { %s3370_s17 = smov (!%p214_p2), 120   ;;  %s3371_s18 = smov (!%p214_p2), 112  }
   0x9   : > { %s3372_s19 = smov (!%p214_p2), 56   ;;  %s3373_s20 = smov (!%p214_p2), 80  }
   0xa   : > { %s3374_s27 = smov (!%p214_p2), 48   ;;  %s3376_s29 = smov (!%p214_p2), 104  }
   0xb   : > { %v3221_v0 = vld [vmem:[%s4025_s1 + $0x8] sm:$0xff]   ;;  %v3222_v1 = vld [vmem:[%s4025_s1] sm:$0xff]   ;;  %s4032_s25 = smov (!%p244_p3, %s2789_s25), 15  ;;  %vm307_vm0 = vcmask 261120   ;;  %v3365_v6 = vmov 0.0   ;;  %vm3366_vm1 = vmmov 0  }
   0xc   : > { %2948 = vmatprep.subr.bf16.mxu0 %v3221_v0  ;;  %3192 = vmatprep.subr.bf16.mxu1 %v3221_v0  ;;  %s2790_s28 = sshll.u32 %s4032_s25, 2  ;;  %v2793_v12 = vld [vmem:[%s4026_s2] ss:$0 sm:$0xff]  ;;  %vm394_vm2 = vcmask 64512   ;;  %vm592_vm3 = vcmask 130048   ;;  %v3496_v42 = vld [vmem:[%s4027_s3 + $0x8] sm:$0xff] }
   0xd   : > { %2949 = vmatpush3.bf16.msra.mxu0 %v3221_v0  ;;  %3194 = vmatpush3.bf16.msra.mxu1 %v3221_v0  ;;  %s247_s7 = scalar_lea.vmem %s4024_s0, %s2790_s28  ;;  %v3489_v36 = vld [vmem:[%s4027_s3] sm:$0xff]  ;;  %vm1388_vm4 = vcmask 1043456   ;;  %s3375_s28 = smov 72  }
   0xe   : > { %2950 = vmatprep.subr.bf16.mxu0 %v3222_v1  ;;  %3193 = vmatprep.subr.bf16.mxu1 %v3222_v1  ;;  %v3223_v2 = vld [vmem:[%s247_s7] sm:$0xff]   ;;  %v3224_v3 = vld [vmem:[%s247_s7 + $0x10] sm:$0xff]   ;;  %v3225_v4 = vld [vmem:[%s247_s7 + $0x8] sm:$0xff]   ;;  %s3377_s12 = smov 40  }
   0xf   : > { %2952 = vmatprep.mubr.msk.bf16.mxu0 %vm307_vm0, %v3223_v2  ;;  %2956 = vmatprep.mubr.msk.bf16.mxu1 %vm307_vm0, %v3224_v3  ;;  %v3226_v5 = vld [vmem:[%s247_s7 + $0x18] sm:$0xff]  }
  0x11   : > { %2951 = vmatpush3.bf16.msra.mxu0 %v3222_v1  ;;  %3195 = vmatpush3.bf16.msra.mxu1 %v3222_v1 }
  0x12   : > { %2960 = vmatprep.subr.bf16.mxu1 %v3365_v6  ;;  %2972 = vmatprep.subr.bf16.mxu0 %v3365_v6 }
  0x14   : > { %2953 = vmatmul.mubr.msk.bf16.vlgmr.msra.gmra.mxu0 %vm307_vm0, %v3225_v4  ;;  %2957 = vmatmul.mubr.msk.bf16.vlgmr.msra.gmra.mxu1 %vm307_vm0, %v3226_v5 }
  0x15   : > { %2962 = vmatprep.mubr.msk.bf16.mxu1 %vm3366_vm1, %v3365_v6  ;;  %2974 = vmatprep.mubr.msk.bf16.mxu0 %vm3366_vm1, %v3365_v6 }
  0xd4   : > { %v2954_v7 = vpop.f32.mrf.mxu0  ;;  %v2958_v8 = vpop.f32.mrf.mxu1 }
  0xd5   : > { %v379_v22 = vadd.f32 %v2958_v8, %v2793_v12  ;;  %v363_v25 = vadd.f32 %v2954_v7, %v2793_v12 }
  0xd6   : > { %v354_v9 = vpop.f32.mrf.mxu0  ;;  %v370_v10 = vpop.f32.mrf.mxu1 }
  0xd7   : > { %v371_v14 = vadd.f32 %v2793_v12, %v370_v10  ;;  %v355_v16 = vadd.f32 %v2793_v12, %v354_v9 }
  0xd8   : > { %v2955_v11 = vpop.f32.mrf.mxu0  ;;  %v2959_v13 = vpop.f32.mrf.mxu1 }
  0xd9   : > { %v366_v20 = vadd.f32 %v2955_v11, %v2793_v12  ;;  %v382_v23 = vadd.f32 %v2959_v13, %v2793_v12 }
  0xda   : > { %v357_v15 = vpop.f32.mrf.mxu0  ;;  %v373_v18 = vpop.f32.mrf.mxu1 }
  0xdb   : > { %v358_v17 = vadd.f32 %v2793_v12, %v357_v15  ;;  %v374_v19 = vadd.f32 %v2793_v12, %v373_v18  ;;  %v3454_v26 = vpack.c.bf16 %v366_v20, %v363_v25  ;;  %v3456_v27 = vpack.c.bf16 %v382_v23, %v379_v22 }
  0xdd   : > { %v3446_v21 = vpack.c.bf16 %v358_v17, %v355_v16  ;;  %v3448_v24 = vpack.c.bf16 %v374_v19, %v371_v14 }
  0xdf   : > { %392 = vrot.lane.b32.xlu0 %v3446_v21, %s3367_s10  ;;  %493 = vrot.lane.b32.xlu1 %v3448_v24, %s3367_s10 }
  0xe3   : > { %443 = vrot.lane.b32.xlu0 %v3454_v26, %s3367_s10  ;;  %543 = vrot.lane.b32.xlu1 %v3456_v27, %s3367_s10 }
 0x151   : > { %v393_v28 = vpop.permute.xlu0 %392  ;;  %v494_v29 = vpop.permute.xlu1 %493 }
 0x152   : > { %v399_v30 = vsel %vm394_vm2, %v393_v28, 0  ;;  %v499_v31 = vsel %vm394_vm2, %v494_v29, 0 }
 0x153   : > { %2961 = vmatpush3.bf16.xpose.msra.mxu1 %v399_v30  ;;  %2973 = vmatpush3.bf16.xpose.msra.mxu0 %v499_v31 }
 0x154   : > { %2966 = vmatprep.subr.bf16.mxu1 %v3365_v6  ;;  %2984 = vmatprep.subr.bf16.mxu0 %v3365_v6 }
 0x155   : > { %v444_v32 = vpop.permute.xlu0 %443  ;;  %v544_v34 = vpop.permute.xlu1 %543 }
 0x156   : > { %v449_v33 = vsel %vm394_vm2, %v444_v32, 0  ;;  %v549_v35 = vsel %vm394_vm2, %v544_v34, 0 }
 0x15a   : > { %2963 = vmatmul.mubr.msk.bf16.vlgmr.msra.gmra.mxu1 %vm394_vm2, %v3446_v21  ;;  %2975 = vmatmul.mubr.msk.bf16.vlgmr.msra.gmra.mxu0 %vm394_vm2, %v3448_v24 }
 0x15b   : > { %2967 = vmatpush3.bf16.xpose.msra.mxu1 %v449_v33  ;;  %2968 = vmatprep.mubr.msk.bf16.mxu1 %vm3366_vm1, %v3365_v6 }
 0x15c   : > { %2978 = vmatprep.subr.bf16.mxu1 %v3365_v6  ;;  %2986 = vmatprep.mubr.msk.bf16.mxu0 %vm3366_vm1, %v3365_v6 }
 0x162   : > { %2969 = vmatmul.mubr.msk.bf16.vlgmr.msra.gmra.mxu1 %vm394_vm2, %v3454_v26 }
 0x163   : > { %2979 = vmatpush3.bf16.xpose.msra.mxu1 %v549_v35  ;;  %2980 = vmatprep.mubr.msk.bf16.mxu1 %vm3366_vm1, %v3365_v6 }
 0x164   : > { %2990 = vmatprep.subr.bf16.mxu1 %v3365_v6 }
 0x16a   : > { %2981 = vmatmul.mubr.msk.bf16.vlgmr.msra.gmra.mxu1 %vm394_vm2, %v3456_v27 }
 0x16b   : > { %2992 = vmatprep.mubr.msk.bf16.mxu1 %vm3366_vm1, %v3365_v6 }
 0x21a   : > { %v435_v37 = vpop.f32.mrf.mxu1  ;;  %v535_v39 = vpop.f32.mrf.mxu0 }
 0x21b   : > { %v436_v38 = vadd.f32 %v435_v37, %v3489_v36  ;;  %v536_v40 = vadd.f32 %v535_v39, %v3489_v36 }
 0x21c   : > { %v2964_v41 = vpop.f32.mrf.mxu1  ;;  %v2976_v43 = vpop.f32.mrf.mxu0 }
 0x21d   : > { %v593_v44 = vsel %vm592_vm3, %v436_v38, -inf  ;;  %v605_v45 = vsel %vm592_vm3, %v536_v40, -inf }
 0x21e   : > { %594 = vmax.xlane.f32.xlu0 %v593_v44  ;;  %v438_v46 = vpop.f32.mrf.mxu1  ;;  %606 = vmax.xlane.f32.xlu1 %v605_v45  ;;  %v538_v47 = vpop.f32.mrf.mxu0 }
 0x21f   : > { %v439_v48 = vadd.f32 %v438_v46, %v3496_v42  ;;  %v539_v59 = vadd.f32 %v538_v47, %v3496_v42 }
 0x220   : > { %v2965_v49 = vpop.f32.mrf.mxu1  ;;  %v2977_v50 = vpop.f32.mrf.mxu0 }
 0x221   : > { %v596_v51 = vsel %vm592_vm3, %v439_v48, -inf  ;;  %v608_v0 = vsel %vm592_vm3, %v539_v59, -inf }
 0x222   : > { %v485_v52 = vpop.f32.mrf.mxu1  ;;  %597 = vmax.xlane.f32.xlu1 %v596_v51 }
 0x223   : > { %v486_v53 = vadd.f32 %v485_v52, %v3489_v36 }
 0x224   : > { %v2970_v54 = vpop.f32.mrf.mxu1 }
 0x225   : > { %v599_v55 = vsel %vm592_vm3, %v486_v53, -inf }
 0x226   : > { %600 = vmax.xlane.f32.xlu0 %v599_v55  ;;  %v488_v56 = vpop.f32.mrf.mxu1 }
 0x227   : > { %v489_v57 = vadd.f32 %v488_v56, %v3496_v42 }
 0x228   : > { %v2971_v58 = vpop.f32.mrf.mxu1 }
 0x229   : > { %v602_v60 = vsel %vm592_vm3, %v489_v57, -inf }
 0x22a   : > { %603 = vmax.xlane.f32.xlu0 %v602_v60  ;;  %v585_v61 = vpop.f32.mrf.mxu1 }
 0x22b   : > { %v3508_v62 = vadd.f32 %v585_v61, %v3489_v36 }
 0x22c   : > { %v2982_v63 = vpop.f32.mrf.mxu1 }
 0x22d   : > { %v611_v1 = vsel %vm592_vm3, %v3508_v62, -inf }
 0x22e   : > { %609 = vmax.xlane.f32.xlu0 %v608_v0  ;;  %612 = vmax.xlane.f32.xlu1 %v611_v1  ;;  %v588_v2 = vpop.f32.mrf.mxu1 }
 0x22f   : > { %v589_v3 = vadd.f32 %v588_v2, %v3496_v42 }
 0x230   : > { %v2983_v4 = vpop.f32.mrf.mxu1 }
 0x231   : > { %v614_v5 = vsel %vm592_vm3, %v589_v3, -inf }
 0x232   : > { %615 = vmax.xlane.f32.xlu0 %v614_v5 }
 0x23f   : > { %685 = vrot.lane.b32.xlu1 %v3446_v21, %s3368_s15 }
 0x2a7   : > { %v595_v7 = vpop.xlane.xlu0 %594  ;;  %v607_v8 = vpop.xlane.xlu1 %606 }
 0x2a8   : > { %v617_v9 = vsub.f32 %v436_v38, %v595_v7  ;;  %v621_v10 = vsub.f32 %v536_v40, %v607_v8 }
 0x2aa   : > { %v625_v11 = vmul.f32 1.442695, %v617_v9  ;;  %v633_v12 = vmul.f32 1.442695, %v621_v10 }
 0x2ab   : > { %v598_v13 = vpop.xlane.xlu1 %597 }
 0x2ac   : > { %3227 = vpow2.f32 %v625_v11  ;;  %v618_v14 = vsub.f32 %v439_v48, %v598_v13 }
 0x2ad   : > { %3229 = vpow2.f32 %v633_v12 }
 0x2ae   : > { %v627_v15 = vmul.f32 1.442695, %v618_v14 }
 0x2af   : > { %v601_v16 = vpop.xlane.xlu0 %600 }
 0x2b0   : > { %v619_v17 = vsub.f32 %v486_v53, %v601_v16  ;;  %3231 = vpow2.f32 %v627_v15 }
 0x2b2   : > { %v629_v18 = vmul.f32 1.442695, %v619_v17 }
 0x2b3   : > { %v604_v19 = vpop.xlane.xlu0 %603 }
 0x2b4   : > { %3233 = vpow2.f32 %v629_v18  ;;  %v620_v20 = vsub.f32 %v489_v57, %v604_v19 }
 0x2b6   : > { %v631_v32 = vmul.f32 1.442695, %v620_v20 }
 0x2b7   : > { %v613_v22 = vpop.xlane.xlu1 %612  ;;  %v610_v23 = vpop.xlane.xlu0 %609 }
 0x2b8   : > { %v622_v25 = vsub.f32 %v539_v59, %v610_v23  ;;  %v623_v45 = vsub.f32 %v3508_v62, %v613_v22 }
 0x2b9   : > { %v3517_v28 = vpop.eup %3227 }
 0x2ba   : > { %v635_v29 = vmul.f32 1.442695, %v622_v25  ;;  %v641_v30 = vsel %vm592_vm3, %v3517_v28, 0.0  ;;  %v3521_v31 = vpop.eup %3229  ;;  %v637_v46 = vmul.f32 1.442695, %v623_v45 }
 0x2bb   : > { %v686_v33 = vpop.permute.xlu1 %685  ;;  %642 = vadd.xlane.f32.xlu1 %v641_v30  ;;  %v653_v35 = vsel %vm592_vm3, %v3521_v31, 0.0  ;;  %v616_v47 = vpop.xlane.xlu0 %615 }
 0x2bc   : > { %2985 = vmatpush3.bf16.msra.mxu0 %v686_v33  ;;  %3235 = vpow2.f32 %v635_v29  ;;  %v624_v48 = vsub.f32 %v589_v3, %v616_v47 }
 0x2bd   : > { %2996 = vmatprep.subr.bf16.mxu0 %v3365_v6  ;;  %v3232_v34 = vpop.eup %3231  ;;  %3237 = vpow2.f32 %v631_v32 }
 0x2be   : > { %v644_v37 = vsel %vm592_vm3, %v3232_v34, 0.0  ;;  %3239 = vpow2.f32 %v637_v46  ;;  %v639_v49 = vmul.f32 1.442695, %v624_v48 }
 0x2bf   : > { %654 = vadd.xlane.f32.xlu1 %v653_v35  ;;  %645 = vadd.xlane.f32.xlu0 %v644_v37 }
 0x2c0   : > { %3241 = vpow2.f32 %v639_v49 }
 0x2c1   : > { %v3527_v38 = vpop.eup %3233 }
 0x2c2   : > { %v647_v39 = vsel %vm592_vm3, %v3527_v38, 0.0 }
 0x2c3   : > { %648 = vadd.xlane.f32.xlu1 %v647_v39 }
 0x2c9   : > { %v3531_v40 = vpop.eup %3235 }
 0x2ca   : > { %v656_v41 = vsel %vm592_vm3, %v3531_v40, 0.0  ;;  %v3535_v43 = vpop.eup %3237 }
 0x2cb   : > { %657 = vadd.xlane.f32.xlu0 %v656_v41  ;;  %v650_v44 = vsel %vm592_vm3, %v3535_v43, 0.0  ;;  %v3546_v50 = vpop.eup %3239 }
 0x2cc   : > { %v659_v51 = vsel %vm592_vm3, %v3546_v50, 0.0 }
 0x2cd   : > { %v3550_v52 = vpop.eup %3241 }
 0x2ce   : > { %v662_v53 = vsel %vm592_vm3, %v3550_v52, 0.0 }
 0x2cf   : > { %651 = vadd.xlane.f32.xlu0 %v650_v44 }
 0x2d4   : > { %779 = vrot.lane.b32.xlu1 %v3448_v24, %s3368_s15 }
 0x2d8   : > { %826 = vrot.lane.b32.xlu1 %v3456_v27, %s3368_s15 }
 0x2e5   : > { %732 = vrot.lane.b32.xlu0 %v3454_v26, %s3368_s15  ;;  %s2792_s15 = sshll.u32 %s4032_s25, 3 }
 0x2fc   : > { %660 = vadd.xlane.f32.xlu1 %v659_v51 }
 0x304   : > { %663 = vadd.xlane.f32.xlu0 %v662_v53 }
 0x30d   : > { %939 = vrot.lane.b32.xlu1 %v3454_v26, %s3369_s16 }
 0x311   : > { %990 = vrot.lane.b32.xlu1 %v3448_v24, %s3369_s16 }
 0x315   : > { %1041 = vrot.lane.b32.xlu1 %v3456_v27, %s3369_s16 }
 0x319   : > { %1039 = vrot.lane.b32.xlu1 %v3456_v27, %s3370_s17 }
 0x31a   : > { %880 = vrot.lane.b32.xlu0 %v3446_v21, %s3369_s16 }
 0x31d   : > { %886 = vrot.lane.b32.xlu1 %v3496_v42, %s3371_s18 }
 0x31e   : > { %878 = vrot.lane.b32.xlu0 %v3446_v21, %s3370_s17 }
 0x322   : > { %937 = vrot.lane.b32.xlu0 %v3454_v26, %s3370_s17 }
 0x326   : > { %988 = vrot.lane.b32.xlu0 %v3448_v24, %s3370_s17 }
 0x32a   : > { %884 = vrot.lane.b32.xlu0 %v3489_v36, %s3371_s18 }
 0x344   : > { %v643_v54 = vpop.xlane.xlu1 %642 }
 0x345   : > { %3243 = vrcp.f32 %v643_v54 }
 0x348   : > { %v646_v55 = vpop.xlane.xlu0 %645  ;;  %v655_v56 = vpop.xlane.xlu1 %654 }
 0x349   : > { %3245 = vrcp.f32 %v646_v55 }
 0x34a   : > { %3247 = vrcp.f32 %v655_v56 }
 0x34c   : > { %v649_v58 = vpop.xlane.xlu1 %648 }
 0x350   : > { %v780_v1 = vpop.permute.xlu1 %779 }
 0x352   : > { %v3244_v57 = vpop.eup %3243 }
 0x353   : > { %v673_v61 = vmul.f32 %v3244_v57, %v3517_v28 }
 0x354   : > { %v658_v59 = vpop.xlane.xlu0 %657  ;;  %v827_v14 = vpop.permute.xlu1 %826 }
 0x355   : > { %3249 = vrcp.f32 %v658_v59 }
 0x356   : > { %v3246_v60 = vpop.eup %3245  ;;  %3251 = vrcp.f32 %v649_v58 }
 0x357   : > { %v674_v62 = vmul.f32 %v3246_v60, %v3232_v34  ;;  %v3248_v3 = vpop.eup %3247 }
 0x358   : > { %v652_v63 = vpop.xlane.xlu0 %651  ;;  %v677_v5 = vmul.f32 %v3248_v3, %v3521_v31 }
 0x359   : > { %3253 = vrcp.f32 %v652_v63  ;;  %v681_v0 = vpack.c.bf16 %v674_v62, %v673_v61 }
 0x35b   : > { %2987 = vmatmul.mubr.msk.bf16.vlgmr.msra.gmra.mxu0 %vm592_vm3, %v681_v0 }
 0x35c   : > { %2997 = vmatpush3.bf16.msra.mxu0 %v780_v1  ;;  %v733_v2 = vpop.permute.xlu0 %732  ;;  %2998 = vmatprep.mubr.msk.bf16.mxu0 %vm3366_vm1, %v3365_v6 }
 0x35d   : > { %2991 = vmatpush3.bf16.msra.mxu1 %v733_v2  ;;  %3008 = vmatprep.subr.bf16.mxu0 %v3365_v6 }
 0x35e   : > { %3002 = vmatprep.subr.bf16.mxu1 %v3365_v6 }
 0x362   : > { %v3250_v4 = vpop.eup %3249 }
 0x363   : > { %v678_v7 = vmul.f32 %v3250_v4, %v3531_v40  ;;  %v3252_v8 = vpop.eup %3251 }
 0x364   : > { %v675_v11 = vmul.f32 %v3252_v8, %v3527_v38 }
 0x365   : > { %v683_v9 = vpack.c.bf16 %v678_v7, %v677_v5 }
 0x366   : > { %v3254_v10 = vpop.eup %3253 }
 0x367   : > { %2999 = vmatmul.mubr.msk.bf16.vlgmr.msra.gmra.mxu0 %vm592_vm3, %v683_v9  ;;  %v676_v12 = vmul.f32 %v3254_v10, %v3535_v43 }
 0x368   : > { %3010 = vmatprep.mubr.msk.bf16.mxu0 %vm3366_vm1, %v3365_v6 }
 0x369   : > { %v682_v13 = vpack.c.bf16 %v676_v12, %v675_v11 }
 0x36b   : > { %2993 = vmatmul.mubr.msk.bf16.vlgmr.msra.gmra.mxu1 %vm592_vm3, %v682_v13 }
 0x36c   : > { %3003 = vmatpush3.bf16.msra.mxu1 %v827_v14  ;;  %3004 = vmatprep.mubr.msk.bf16.mxu1 %vm3366_vm1, %v3365_v6 }
 0x36d   : > { %3014 = vmatprep.subr.bf16.mxu1 %v3365_v6 }
 0x385   : > { %v661_v15 = vpop.xlane.xlu1 %660 }
 0x386   : > { %3255 = vrcp.f32 %v661_v15 }
 0x389   : > { %v940_v17 = vpop.permute.xlu1 %939 }
 0x38a   : > { %v945_v33 = vsel %vm394_vm2, %v940_v17, 0 }
 0x38d   : > { %v664_v16 = vpop.xlane.xlu0 %663  ;;  %v991_v22 = vpop.permute.xlu1 %990 }
 0x38e   : > { %3257 = vrcp.f32 %v664_v16  ;;  %v996_v25 = vsel %vm394_vm2, %v991_v22, 0 }
 0x391   : > { %v881_v18 = vpop.permute.xlu0 %880  ;;  %v1042_v35 = vpop.permute.xlu1 %1041 }
 0x392   : > { %v894_v19 = vsel %vm394_vm2, %v881_v18, 0  ;;  %v1047_v37 = vsel %vm394_vm2, %v1042_v35, 0 }
 0x393   : > { %3009 = vmatpush3.bf16.xpose.msra.mxu0 %v894_v19  ;;  %v3256_v23 = vpop.eup %3255 }
 0x394   : > { %3020 = vmatprep.subr.bf16.mxu0 %v3365_v6  ;;  %v679_v30 = vmul.f32 %v3256_v23, %v3546_v50 }
 0x395   : > { %v879_v20 = vpop.permute.xlu0 %878  ;;  %v1040_v38 = vpop.permute.xlu1 %1039 }
 0x399   : > { %v938_v29 = vpop.permute.xlu0 %937  ;;  %v887_v59 = vpop.permute.xlu1 %886 }
 0x39a   : > { %3011 = vmatmul.mubr.msk.bf16.vlgmr.msra.gmra.mxu0 %vm394_vm2, %v879_v20 }
 0x39b   : > { %v3258_v28 = vpop.eup %3257  ;;  %3021 = vmatpush3.bf16.xpose.msra.mxu0 %v996_v25  ;;  %3022 = vmatprep.mubr.msk.bf16.mxu0 %vm3366_vm1, %v3365_v6 }
 0x39c   : > { %v680_v31 = vmul.f32 %v3258_v28, %v3550_v52  ;;  %3032 = vmatprep.subr.bf16.mxu0 %v3365_v6 }
 0x39d   : > { %v989_v34 = vpop.permute.xlu0 %988 }
 0x39e   : > { %v684_v32 = vpack.c.bf16 %v680_v31, %v679_v30 }
 0x3a0   : > { %3005 = vmatmul.mubr.msk.bf16.vlgmr.msra.gmra.mxu1 %vm592_vm3, %v684_v32 }
 0x3a1   : > { %3015 = vmatpush3.bf16.xpose.msra.mxu1 %v945_v33  ;;  %3016 = vmatprep.mubr.msk.bf16.mxu1 %vm3366_vm1, %v3365_v6  ;;  %v885_v55 = vpop.permute.xlu0 %884 }
 0x3a2   : > { %3023 = vmatmul.mubr.msk.bf16.vlgmr.msra.gmra.mxu0 %vm394_vm2, %v989_v34  ;;  %3026 = vmatprep.subr.bf16.mxu1 %v3365_v6 }
 0x3a3   : > { %3034 = vmatprep.mubr.msk.bf16.mxu0 %vm3366_vm1, %v3365_v6 }
 0x3a8   : > { %3017 = vmatmul.mubr.msk.bf16.vlgmr.msra.gmra.mxu1 %vm394_vm2, %v938_v29 }
 0x3a9   : > { %3027 = vmatpush3.bf16.xpose.msra.mxu1 %v1047_v37  ;;  %3028 = vmatprep.mubr.msk.bf16.mxu1 %vm3366_vm1, %v3365_v6 }
 0x3aa   : > { %3038 = vmatprep.subr.bf16.mxu1 %v3365_v6 }
 0x3b0   : > { %3029 = vmatmul.mubr.msk.bf16.vlgmr.msra.gmra.mxu1 %vm394_vm2, %v1040_v38 }
 0x3b1   : > { %3040 = vmatprep.mubr.msk.bf16.mxu1 %vm3366_vm1, %v3365_v6 }
 0x41b   : > { %v3608_v39 = vpop.f32.mrf.mxu0 }
 0x41d   : > { %v2988_v40 = vpop.f32.mrf.mxu0 }
 0x41f   : > { %v3610_v41 = vpop.f32.mrf.mxu0 }
 0x420   : > { %v873_v43 = vpack.c.bf16 %v3610_v41, %v3608_v39 }
 0x421   : > { %v2989_v44 = vpop.f32.mrf.mxu0 }
 0x427   : > { %v3614_v45 = vpop.f32.mrf.mxu0 }
 0x429   : > { %v3000_v46 = vpop.f32.mrf.mxu0 }
 0x42b   : > { %v3616_v47 = vpop.f32.mrf.mxu1  ;;  %v3618_v48 = vpop.f32.mrf.mxu0 }
 0x42c   : > { %v875_v49 = vpack.c.bf16 %v3618_v48, %v3614_v45  ;;  %v2820_v48 = vld [vmem:[%s4028_s4 + $0x4] sm:$0xf] }
 0x42d   : > { %v2994_v50 = vpop.f32.mrf.mxu1  ;;  %v3001_v51 = vpop.f32.mrf.mxu0 }
 0x42f   : > { %v3622_v52 = vpop.f32.mrf.mxu1 }
 0x430   : > { %v874_v53 = vpack.c.bf16 %v3622_v52, %v3616_v47 }
 0x431   : > { %v2995_v54 = vpop.f32.mrf.mxu1 }
 0x45a   : > { %v930_v56 = vpop.f32.mrf.mxu0 }
 0x45b   : > { %v931_v57 = vadd.f32 %v930_v56, %v885_v55 }
 0x45c   : > { %v3012_v58 = vpop.f32.mrf.mxu0 }
 0x45d   : > { %v1090_v60 = vsel %vm592_vm3, %v931_v57, -inf }
 0x45e   : > { %v933_v61 = vpop.f32.mrf.mxu0  ;;  %1091 = vmax.xlane.f32.xlu0 %v1090_v60 }
 0x45f   : > { %v934_v62 = vadd.f32 %v933_v61, %v887_v59 }
 0x460   : > { %v3627_v63 = vpop.f32.mrf.mxu1  ;;  %v3013_v0 = vpop.f32.mrf.mxu0 }
 0x461   : > { %v1093_v1 = vsel %vm592_vm3, %v934_v62, -inf }
 0x462   : > { %v3006_v2 = vpop.f32.mrf.mxu1  ;;  %1094 = vmax.xlane.f32.xlu1 %v1093_v1  ;;  %v1032_v3 = vpop.f32.mrf.mxu0 }
 0x463   : > { %v1033_v4 = vadd.f32 %v1032_v3, %v885_v55 }
 0x464   : > { %v3630_v5 = vpop.f32.mrf.mxu1  ;;  %v3024_v7 = vpop.f32.mrf.mxu0 }
 0x465   : > { %v876_v8 = vpack.c.bf16 %v3630_v5, %v3627_v63  ;;  %v1102_v9 = vsel %vm592_vm3, %v1033_v4, -inf }
 0x466   : > { %v3007_v10 = vpop.f32.mrf.mxu1  ;;  %v1035_v11 = vpop.f32.mrf.mxu0  ;;  %1103 = vmax.xlane.f32.xlu1 %v1102_v9 }
 0x467   : > { %v1036_v20 = vadd.f32 %v1035_v11, %v887_v59 }
 0x468   : > { %v981_v12 = vpop.f32.mrf.mxu1  ;;  %v3025_v13 = vpop.f32.mrf.mxu0 }
 0x469   : > { %v982_v14 = vadd.f32 %v981_v12, %v885_v55  ;;  %v1105_v30 = vsel %vm592_vm3, %v1036_v20, -inf }
 0x46a   : > { %v3018_v15 = vpop.f32.mrf.mxu1 }
 0x46b   : > { %v1096_v16 = vsel %vm592_vm3, %v982_v14, -inf }
 0x46c   : > { %v984_v17 = vpop.f32.mrf.mxu1  ;;  %1097 = vmax.xlane.f32.xlu0 %v1096_v16 }
 0x46d   : > { %v985_v18 = vadd.f32 %v984_v17, %v887_v59 }
 0x46e   : > { %v3019_v19 = vpop.f32.mrf.mxu1 }
 0x46f   : > { %v1099_v22 = vsel %vm592_vm3, %v985_v18, -inf }
 0x470   : > { %v1083_v23 = vpop.f32.mrf.mxu1  ;;  %1100 = vmax.xlane.f32.xlu0 %v1099_v22 }
 0x471   : > { %v1084_v25 = vadd.f32 %v1083_v23, %v885_v55 }
 0x472   : > { %v3030_v28 = vpop.f32.mrf.mxu1 }
 0x473   : > { %v1108_v29 = vsel %vm592_vm3, %v1084_v25, -inf }
 0x474   : > { %v1086_v31 = vpop.f32.mrf.mxu1  ;;  %1109 = vmax.xlane.f32.xlu1 %v1108_v29  ;;  %1106 = vmax.xlane.f32.xlu0 %v1105_v30 }
 0x475   : > { %v1087_v32 = vadd.f32 %v1086_v31, %v887_v59 }
 0x476   : > { %v3031_v33 = vpop.f32.mrf.mxu1 }
 0x477   : > { %v1111_v34 = vsel %vm592_vm3, %v1087_v32, -inf }
 0x478   : > { %1112 = vmax.xlane.f32.xlu0 %v1111_v34 }
 0x485   : > { %1182 = vrot.lane.b32.xlu1 %v3446_v21, %s3372_s19 }
 0x4e7   : > { %v1092_v35 = vpop.xlane.xlu0 %1091 }
 0x4e8   : > { %v1114_v37 = vsub.f32 %v931_v57, %v1092_v35 }
 0x4ea   : > { %v1122_v38 = vmul.f32 1.442695, %v1114_v37 }
 0x4eb   : > { %v1095_v40 = vpop.xlane.xlu1 %1094 }
 0x4ec   : > { %3259 = vpow2.f32 %v1122_v38  ;;  %v1115_v44 = vsub.f32 %v934_v62, %v1095_v40 }
 0x4ee   : > { %v1124_v46 = vmul.f32 1.442695, %v1115_v44 }
 0x4ef   : > { %v1104_v50 = vpop.xlane.xlu1 %1103 }
 0x4f0   : > { %3261 = vpow2.f32 %v1124_v46  ;;  %v1118_v51 = vsub.f32 %v1033_v4, %v1104_v50 }
 0x4f2   : > { %v1130_v56 = vmul.f32 1.442695, %v1118_v51 }
 0x4f5   : > { %v1098_v54 = vpop.xlane.xlu0 %1097 }
 0x4f6   : > { %v1116_v55 = vsub.f32 %v982_v14, %v1098_v54 }
 0x4f8   : > { %v1126_v58 = vmul.f32 1.442695, %v1116_v55 }
 0x4f9   : > { %v3642_v59 = vpop.eup %3259  ;;  %v1101_v60 = vpop.xlane.xlu0 %1100 }
 0x4fa   : > { %3263 = vpow2.f32 %v1126_v58  ;;  %v1117_v61 = vsub.f32 %v985_v18, %v1101_v60  ;;  %v1138_v57 = vsel %vm592_vm3, %v3642_v59, 0.0 }
 0x4fb   : > { %1139 = vadd.xlane.f32.xlu1 %v1138_v57  ;;  %3265 = vpow2.f32 %v1130_v56 }
 0x4fc   : > { %v1128_v0 = vmul.f32 1.442695, %v1117_v61 }
 0x4fd   : > { %v3262_v62 = vpop.eup %3261  ;;  %v1110_v1 = vpop.xlane.xlu1 %1109 }
 0x4fe   : > { %v1107_v2 = vpop.xlane.xlu0 %1106  ;;  %3267 = vpow2.f32 %v1128_v0  ;;  %v1120_v3 = vsub.f32 %v1084_v25, %v1110_v1  ;;  %v1141_v7 = vsel %vm592_vm3, %v3262_v62, 0.0  ;;  %v877_v0 = vld [vmem:[%s4028_s4] sm:$0xf] }
 0x4ff   : > { %v1119_v4 = vsub.f32 %v1036_v20, %v1107_v2  ;;  %1142 = vadd.xlane.f32.xlu0 %v1141_v7 }
 0x500   : > { %v1134_v9 = vmul.f32 1.442695, %v1120_v3 }
 0x501   : > { %v1132_v10 = vmul.f32 1.442695, %v1119_v4  ;;  %v1183_v11 = vpop.permute.xlu1 %1182 }
 0x502   : > { %v1113_v12 = vpop.xlane.xlu0 %1112  ;;  %3269 = vpow2.f32 %v1134_v9  ;;  %3033 = vmatpush3.bf16.msra.mxu0 %v1183_v11 }
 0x503   : > { %v1121_v13 = vsub.f32 %v1087_v32, %v1113_v12  ;;  %3271 = vpow2.f32 %v1132_v10  ;;  %3044 = vmatprep.subr.bf16.mxu0 %v3365_v6  ;;  %v1470_v12 = vsel %vm1388_vm4, %v877_v0, 0 }
 0x505   : > { %v1136_v14 = vmul.f32 1.442695, %v1121_v13 }
 0x507   : > { %3273 = vpow2.f32 %v1136_v14  ;;  %v3264_v15 = vpop.eup %3263 }
 0x508   : > { %v1144_v16 = vsel %vm592_vm3, %v3264_v15, 0.0  ;;  %v3649_v17 = vpop.eup %3265 }
 0x509   : > { %1145 = vadd.xlane.f32.xlu1 %v1144_v16  ;;  %v1150_v19 = vsel %vm592_vm3, %v3649_v17, 0.0 }
 0x50b   : > { %v3268_v18 = vpop.eup %3267 }
 0x50c   : > { %v1147_v20 = vsel %vm592_vm3, %v3268_v18, 0.0 }
 0x50d   : > { %1151 = vadd.xlane.f32.xlu1 %v1150_v19  ;;  %1148 = vadd.xlane.f32.xlu0 %v1147_v20 }
 0x50f   : > { %v3654_v22 = vpop.eup %3269 }
 0x510   : > { %v3272_v23 = vpop.eup %3271  ;;  %v1156_v25 = vsel %vm592_vm3, %v3654_v22, 0.0 }
 0x511   : > { %1157 = vadd.xlane.f32.xlu1 %v1156_v25  ;;  %v1153_v28 = vsel %vm592_vm3, %v3272_v23, 0.0 }
 0x512   : > { %1154 = vadd.xlane.f32.xlu0 %v1153_v28 }
 0x514   : > { %v3659_v29 = vpop.eup %3273 }
 0x515   : > { %v1159_v30 = vsel %vm592_vm3, %v3659_v29, 0.0 }
 0x516   : > { %1160 = vadd.xlane.f32.xlu0 %v1159_v30 }
 0x522   : > { %1276 = vrot.lane.b32.xlu1 %v3448_v24, %s3372_s19 }
 0x526   : > { %1323 = vrot.lane.b32.xlu1 %v3456_v27, %s3372_s19 }
 0x52a   : > { %1596 = vrot.lane.b32.xlu1 %v3454_v26, %s3373_s20 }
 0x52c   : > { %1229 = vrot.lane.b32.xlu0 %v3454_v26, %s3372_s19 }
 0x52e   : > { %1647 = vrot.lane.b32.xlu1 %v3448_v24, %s3373_s20 }
 0x530   : > { %1539 = vrot.lane.b32.xlu0 %v3446_v21, %s3373_s20 }
 0x532   : > { %1698 = vrot.lane.b32.xlu1 %v3456_v27, %s3373_s20 }
 0x534   : > { %1537 = vrot.lane.b32.xlu0 %v3446_v21, %s3371_s18 }
 0x536   : > { %1696 = vrot.lane.b32.xlu1 %v3456_v27, %s3371_s18 }
 0x538   : > { %1594 = vrot.lane.b32.xlu0 %v3454_v26, %s3371_s18 }
 0x53a   : > { %1543 = vrot.lane.b32.xlu1 %v3496_v42, %s3367_s10 }
 0x53c   : > { %1645 = vrot.lane.b32.xlu0 %v3448_v24, %s3371_s18 }
 0x540   : > { %1541 = vrot.lane.b32.xlu0 %v3489_v36, %s3367_s10 }
 0x584   : > { %v1140_v31 = vpop.xlane.xlu1 %1139 }
 0x585   : > { %3275 = vrcp.f32 %v1140_v31 }
 0x588   : > { %v1143_v32 = vpop.xlane.xlu0 %1142 }
 0x589   : > { %3277 = vrcp.f32 %v1143_v32 }
 0x592   : > { %v1146_v33 = vpop.xlane.xlu1 %1145  ;;  %v3276_v34 = vpop.eup %3275 }
 0x593   : > { %3279 = vrcp.f32 %v1146_v33  ;;  %v1170_v40 = vmul.f32 %v3276_v34, %v3642_v59 }
 0x596   : > { %v3278_v35 = vpop.eup %3277  ;;  %v1152_v37 = vpop.xlane.xlu1 %1151 }
 0x597   : > { %v1149_v38 = vpop.xlane.xlu0 %1148  ;;  %v1171_v44 = vmul.f32 %v3278_v35, %v3262_v62 }
 0x598   : > { %3281 = vrcp.f32 %v1149_v38 }
 0x599   : > { %v1178_v42 = vpack.c.bf16 %v1171_v44, %v1170_v40  ;;  %3283 = vrcp.f32 %v1152_v37 }
 0x59a   : > { %v1158_v46 = vpop.xlane.xlu1 %1157 }
 0x59b   : > { %v1155_v50 = vpop.xlane.xlu0 %1154  ;;  %3035 = vmatmul.mubr.msk.bf16.vlgmr.msra.gmra.mxu0 %vm592_vm3, %v1178_v42 }
 0x59c   : > { %3285 = vrcp.f32 %v1155_v50  ;;  %3046 = vmatprep.mubr.msk.bf16.mxu0 %vm3366_vm1, %v3365_v6 }
 0x59d   : > { %3287 = vrcp.f32 %v1158_v46 }
 0x59e   : > { %v1277_v36 = vpop.permute.xlu1 %1276 }
 0x59f   : > { %v1161_v51 = vpop.xlane.xlu0 %1160  ;;  %3045 = vmatpush3.bf16.msra.mxu0 %v1277_v36 }
 0x5a0   : > { %3289 = vrcp.f32 %v1161_v51  ;;  %v3280_v54 = vpop.eup %3279  ;;  %3196 = vmatprep.subr.msk.bf16.mxu0 %vm1388_vm4, %v2820_v48 }
 0x5a1   : > { %v1172_v58 = vmul.f32 %v3280_v54, %v3264_v15 }
 0x5a2   : > { %v1324_v62 = vpop.permute.xlu1 %1323 }
 0x5a3   : > { %v1230_v55 = vpop.permute.xlu0 %1229 }
 0x5a4   : > { %3039 = vmatpush3.bf16.msra.mxu1 %v1230_v55 }
 0x5a5   : > { %v3282_v56 = vpop.eup %3281  ;;  %3050 = vmatprep.subr.bf16.mxu1 %v3365_v6 }
 0x5a6   : > { %v1173_v59 = vmul.f32 %v3282_v56, %v3268_v18  ;;  %v3284_v60 = vpop.eup %3283  ;;  %v1597_v13 = vpop.permute.xlu1 %1596 }
 0x5a7   : > { %v1174_v1 = vmul.f32 %v3284_v60, %v3649_v17  ;;  %v1602_v14 = vsel %vm394_vm2, %v1597_v13, 0  ;;  %v1540_v39 = vpop.permute.xlu0 %1539 }
 0x5a8   : > { %v1179_v61 = vpack.c.bf16 %v1173_v59, %v1172_v58  ;;  %v1551_v28 = vsel %vm394_vm2, %v1540_v39, 0 }
 0x5a9   : > { %v3286_v57 = vpop.eup %3285 }
 0x5aa   : > { %3041 = vmatmul.mubr.msk.bf16.vlgmr.msra.gmra.mxu1 %vm592_vm3, %v1179_v61  ;;  %v1175_v2 = vmul.f32 %v3286_v57, %v3272_v23  ;;  %v3288_v3 = vpop.eup %3287  ;;  %v1648_v41 = vpop.permute.xlu1 %1647 }
 0x5ab   : > { %3051 = vmatpush3.bf16.msra.mxu1 %v1324_v62  ;;  %3052 = vmatprep.mubr.msk.bf16.mxu1 %vm3366_vm1, %v3365_v6  ;;  %v1176_v9 = vmul.f32 %v3288_v3, %v3654_v22  ;;  %v1653_v46 = vsel %vm394_vm2, %v1648_v41, 0 }
 0x5ac   : > { %v1180_v4 = vpack.c.bf16 %v1175_v2, %v1174_v1  ;;  %3197 = vmatprep.subr.msk.bf16.mxu1 %vm1388_vm4, %v877_v0 }
 0x5ad   : > { %v3290_v7 = vpop.eup %3289 }
 0x5ae   : > { %3047 = vmatmul.mubr.msk.bf16.vlgmr.msra.gmra.mxu0 %vm592_vm3, %v1180_v4  ;;  %v1177_v10 = vmul.f32 %v3290_v7, %v3659_v29  ;;  %v1699_v47 = vpop.permute.xlu1 %1698 }
 0x5b0   : > { %v1181_v11 = vpack.c.bf16 %v1177_v10, %v1176_v9 }
 0x5b2   : > { %3053 = vmatmul.mubr.msk.bf16.vlgmr.msra.gmra.mxu1 %vm592_vm3, %v1181_v11  ;;  %v1697_v45 = vpop.permute.xlu1 %1696 }
 0x5b3   : > { %3068 = vmatprep.mubr.msk.bf16.mxu1 %vm394_vm2, %v873_v43  ;;  %3067 = vmatpush3.bf16.msra.mxu1 %v1470_v12  ;;  %v1538_v43 = vpop.permute.xlu0 %1537 }
 0x5b4   : > { %3082 = vmatprep.subr.bf16.mxu1 %v3365_v6 }
 0x5b7   : > { %v1595_v52 = vpop.permute.xlu0 %1594 }
 0x5ba   : > { %3069 = vmatmul.mubr.msk.bf16.vlgmr.msra.gmra.mxu1 %vm394_vm2, %v874_v53  ;;  %v1704_v53 = vsel %vm394_vm2, %v1699_v47, 0  ;;  %v1544_v47 = vpop.permute.xlu1 %1543 }
 0x5bb   : > { %3083 = vmatpush3.bf16.xpose.msra.mxu1 %v1602_v14  ;;  %3072 = vmatprep.mubr.msk.bf16.mxu1 %vm394_vm2, %v875_v49  ;;  %v1390_v49 = vsel %vm1388_vm4, %v2820_v48, 0  ;;  %v1646_v54 = vpop.permute.xlu0 %1645 }
 0x5bc   : > { %3094 = vmatprep.subr.bf16.mxu1 %v3365_v6  ;;  %3057 = vmatpush3.bf16.msra.mxu0 %v1390_v49 }
 0x5bd   : > { %3076 = vmatprep.subr.bf16.mxu0 %v3365_v6 }
 0x5bf   : > { %v1542_v12 = vpop.permute.xlu0 %1541 }
 0x5c2   : > { %3073 = vmatmul.mubr.msk.bf16.gmra.mxu1 %vm394_vm2, %v876_v8 }
 0x5c3   : > { %3084 = vmatprep.mubr.msk.bf16.mxu1 %vm3366_vm1, %v3365_v6 }
 0x5ca   : > { %3085 = vmatmul.mubr.msk.bf16.vlgmr.msra.gmra.mxu1 %vm394_vm2, %v1595_v52 }
 0x5cb   : > { %3095 = vmatpush3.bf16.xpose.msra.mxu1 %v1704_v53  ;;  %3096 = vmatprep.mubr.msk.bf16.mxu1 %vm3366_vm1, %v3365_v6 }
 0x5cc   : > { %3106 = vmatprep.subr.bf16.mxu1 %v3365_v6 }
 0x5d2   : > { %3097 = vmatmul.mubr.msk.bf16.vlgmr.msra.gmra.mxu1 %vm394_vm2, %v1697_v45 }
 0x5d3   : > { %3108 = vmatprep.mubr.msk.bf16.mxu1 %vm3366_vm1, %v3365_v6 }
 0x65b   : > { %v1222_v63 = vpop.f32.mrf.mxu0 }
 0x65d   : > { %v3036_v5 = vpop.f32.mrf.mxu0 }
 0x65f   : > { %v1225_v8 = vpop.f32.mrf.mxu0 }
 0x660   : > { %v1370_v15 = vpack.c.bf16 %v1225_v8, %v1222_v63 }
 0x661   : > { %v3037_v16 = vpop.f32.mrf.mxu0 }
 0x662   : > { %3058 = vmatprep.mubr.msk.bf16.mxu0 %vm394_vm2, %v1370_v15 }
 0x66a   : > { %v1269_v17 = vpop.f32.mrf.mxu1 }
 0x66c   : > { %v3042_v18 = vpop.f32.mrf.mxu1 }
 0x66e   : > { %v1272_v19 = vpop.f32.mrf.mxu1  ;;  %v1316_v20 = vpop.f32.mrf.mxu0 }
 0x66f   : > { %v1371_v22 = vpack.c.bf16 %v1272_v19, %v1269_v17 }
 0x670   : > { %v3043_v23 = vpop.f32.mrf.mxu1  ;;  %v3048_v25 = vpop.f32.mrf.mxu0 }
 0x671   : > { %3059 = vmatmul.mubr.msk.bf16.vlgmr.msra.gmra.mxu0 %vm394_vm2, %v1371_v22 }
 0x672   : > { %3077 = vmatpush3.bf16.xpose.msra.mxu0 %v1551_v28  ;;  %v1319_v29 = vpop.f32.mrf.mxu0  ;;  %v1363_v30 = vpop.f32.mrf.mxu1 }
 0x673   : > { %v1372_v31 = vpack.c.bf16 %v1319_v29, %v1316_v20  ;;  %3088 = vmatprep.subr.bf16.mxu0 %v3365_v6 }
 0x674   : > { %v3049_v32 = vpop.f32.mrf.mxu0  ;;  %v3054_v33 = vpop.f32.mrf.mxu1 }
 0x675   : > { %3062 = vmatprep.mubr.msk.bf16.mxu0 %vm394_vm2, %v1372_v31 }
 0x676   : > { %v1366_v34 = vpop.f32.mrf.mxu1 }
 0x677   : > { %v1373_v35 = vpack.c.bf16 %v1366_v34, %v1363_v30 }
 0x678   : > { %v3055_v37 = vpop.f32.mrf.mxu1 }
 0x679   : > { %3063 = vmatmul.mubr.msk.bf16.gmra.mxu0 %vm394_vm2, %v1373_v35 }
 0x67a   : > { %v3748_v38 = vpop.f32.mrf.mxu1  ;;  %3078 = vmatprep.mubr.msk.bf16.mxu0 %vm3366_vm1, %v3365_v6 }
 0x67c   : > { %v3752_v40 = vpop.f32.mrf.mxu1 }
 0x67e   : > { %v3754_v44 = vpop.f32.mrf.mxu1 }
 0x680   : > { %v3756_v42 = vpop.f32.mrf.mxu1 }
 0x681   : > { %3079 = vmatmul.mubr.msk.bf16.vlgmr.msra.gmra.mxu0 %vm394_vm2, %v1538_v43 }
 0x682   : > { %3089 = vmatpush3.bf16.xpose.msra.mxu0 %v1653_v46  ;;  %v3760_v50 = vpop.f32.mrf.mxu1  ;;  %3090 = vmatprep.mubr.msk.bf16.mxu0 %vm3366_vm1, %v3365_v6 }
 0x683   : > { %3100 = vmatprep.subr.bf16.mxu0 %v3365_v6 }
 0x684   : > { %v3765_v36 = vpop.f32.mrf.mxu1 }
 0x686   : > { %v3767_v51 = vpop.f32.mrf.mxu1 }
 0x688   : > { %v3769_v55 = vpop.f32.mrf.mxu1 }
 0x689   : > { %3091 = vmatmul.mubr.msk.bf16.vlgmr.msra.gmra.mxu0 %vm394_vm2, %v1646_v54 }
 0x68a   : > { %v1638_v56 = vpop.f32.mrf.mxu1  ;;  %3102 = vmatprep.mubr.msk.bf16.mxu0 %vm3366_vm1, %v3365_v6 }
 0x68b   : > { %v1639_v43 = vadd.f32 %v1638_v56, %v1542_v12 }
 0x68c   : > { %v3086_v58 = vpop.f32.mrf.mxu1 }
 0x68d   : > { %v1753_v63 = vsel %vm592_vm3, %v1639_v43, -inf }
 0x68e   : > { %v1641_v59 = vpop.f32.mrf.mxu1 }
 0x68f   : > { %v1642_v48 = vadd.f32 %v1641_v59, %v1544_v47 }
 0x690   : > { %v3087_v60 = vpop.f32.mrf.mxu1 }
 0x691   : > { %v1756_v18 = vsel %vm592_vm3, %v1642_v48, -inf }
 0x692   : > { %v1740_v61 = vpop.f32.mrf.mxu1 }
 0x693   : > { %v1741_v16 = vadd.f32 %v1740_v61, %v1542_v12 }
 0x694   : > { %v3098_v57 = vpop.f32.mrf.mxu1 }
 0x695   : > { %v1765_v25 = vsel %vm592_vm3, %v1741_v16, -inf }
 0x696   : > { %v1743_v0 = vpop.f32.mrf.mxu1 }
 0x697   : > { %v1744_v23 = vadd.f32 %v1743_v0, %v1544_v47 }
 0x698   : > { %v3099_v62 = vpop.f32.mrf.mxu1 }
 0x699   : > { %v1768_v29 = vsel %vm592_vm3, %v1744_v23, -inf }
 0x731   : > { %v3774_v1 = vpop.f32.mrf.mxu0 }
 0x733   : > { %v3776_v2 = vpop.f32.mrf.mxu0 }
 0x735   : > { %v3778_v3 = vpop.f32.mrf.mxu0 }
 0x737   : > { %v3780_v4 = vpop.f32.mrf.mxu0 }
 0x739   : > { %v3782_v7 = vpop.f32.mrf.mxu0 }
 0x73b   : > { %v3784_v9 = vpop.f32.mrf.mxu0 }
 0x73d   : > { %v3786_v10 = vpop.f32.mrf.mxu0 }
 0x73f   : > { %v3788_v11 = vpop.f32.mrf.mxu0 }
 0x741   : > { %v1587_v13 = vpop.f32.mrf.mxu0 }
 0x742   : > { %v3790_v14 = vadd.f32 %v1587_v13, %v1542_v12 }
 0x743   : > { %v3080_v39 = vpop.f32.mrf.mxu0 }
 0x744   : > { %v1747_v41 = vsel %vm592_vm3, %v3790_v14, -inf }
 0x745   : > { %v1590_v52 = vpop.f32.mrf.mxu0  ;;  %1748 = vmax.xlane.f32.xlu0 %v1747_v41 }
 0x746   : > { %v1591_v53 = vadd.f32 %v1590_v52, %v1544_v47 }
 0x747   : > { %v3081_v45 = vpop.f32.mrf.mxu0 }
 0x748   : > { %v1750_v49 = vsel %vm592_vm3, %v1591_v53, -inf }
 0x749   : > { %1751 = vmax.xlane.f32.xlu1 %v1750_v49  ;;  %v1689_v5 = vpop.f32.mrf.mxu0  ;;  %1754 = vmax.xlane.f32.xlu0 %v1753_v63 }
 0x74a   : > { %v3796_v8 = vadd.f32 %v1689_v5, %v1542_v12 }
 0x74b   : > { %v3092_v15 = vpop.f32.mrf.mxu0 }
 0x74c   : > { %v1759_v17 = vsel %vm592_vm3, %v3796_v8, -inf }
 0x74d   : > { %v1692_v19 = vpop.f32.mrf.mxu0  ;;  %1760 = vmax.xlane.f32.xlu1 %v1759_v17  ;;  %1757 = vmax.xlane.f32.xlu0 %v1756_v18 }
 0x74e   : > { %v1693_v20 = vadd.f32 %v1692_v19, %v1544_v47 }
 0x74f   : > { %v3093_v22 = vpop.f32.mrf.mxu0 }
 0x750   : > { %v1762_v28 = vsel %vm592_vm3, %v1693_v20, -inf }
 0x751   : > { %1766 = vmax.xlane.f32.xlu1 %v1765_v25  ;;  %1763 = vmax.xlane.f32.xlu0 %v1762_v28  ;;  %v3356_v28 = vld [vmem:[%s4027_s3 + $0x8] sm:$0xff] }
 0x755   : > { %1769 = vmax.xlane.f32.xlu0 %v1768_v29 }
 0x7ce   : > { %v1749_v30 = vpop.xlane.xlu0 %1748 }
 0x7cf   : > { %v1771_v17 = vsub.f32 %v3790_v14, %v1749_v30 }
 0x7d1   : > { %v1779_v18 = vmul.f32 1.442695, %v1771_v17 }
 0x7d2   : > { %v1752_v31 = vpop.xlane.xlu1 %1751  ;;  %v1755_v32 = vpop.xlane.xlu0 %1754 }
 0x7d3   : > { %v1773_v33 = vsub.f32 %v1639_v43, %v1755_v32  ;;  %v1772_v60 = vsub.f32 %v1591_v53, %v1752_v31 }
 0x7d5   : > { %v1783_v34 = vmul.f32 1.442695, %v1773_v33  ;;  %v1781_v62 = vmul.f32 1.442695, %v1772_v60 }
 0x7d6   : > { %v1761_v35 = vpop.xlane.xlu1 %1760  ;;  %v1758_v37 = vpop.xlane.xlu0 %1757 }
 0x7d7   : > { %v1774_v46 = vsub.f32 %v1642_v48, %v1758_v37  ;;  %3291 = vpow2.f32 %v1783_v34  ;;  %v1775_v19 = vsub.f32 %v3796_v8, %v1761_v35  ;;  %v3355_v8 = vld [vmem:[%s4027_s3] sm:$0xff] }
 0x7d9   : > { %v1785_v54 = vmul.f32 1.442695, %v1774_v46 }
 0x7da   : > { %v1767_v56 = vpop.xlane.xlu1 %1766  ;;  %v1764_v58 = vpop.xlane.xlu0 %1763 }
 0x7db   : > { %v1777_v59 = vsub.f32 %v1741_v16, %v1767_v56  ;;  %3293 = vpow2.f32 %v1785_v54  ;;  %v1776_v12 = vsub.f32 %v1693_v20, %v1764_v58  ;;  %v1787_v20 = vmul.f32 1.442695, %v1775_v19 }
 0x7dd   : > { %v1791_v61 = vmul.f32 1.442695, %v1777_v59  ;;  %v1789_v41 = vmul.f32 1.442695, %v1776_v12 }
 0x7de   : > { %v1770_v57 = vpop.xlane.xlu0 %1769 }
 0x7df   : > { %3295 = vpow2.f32 %v1791_v61  ;;  %v1778_v0 = vsub.f32 %v1744_v23, %v1770_v57 }
 0x7e1   : > { %v1793_v13 = vmul.f32 1.442695, %v1778_v0 }
 0x7e3   : > { %3297 = vpow2.f32 %v1793_v13 }
 0x7e4   : > { %v3804_v39 = vpop.eup %3291  ;;  %3299 = vpow2.f32 %v1781_v62 }
 0x7e5   : > { %v1801_v43 = vsel %vm592_vm3, %v3804_v39, 0.0  ;;  %3301 = vpow2.f32 %v1789_v41 }
 0x7e6   : > { %1802 = vadd.xlane.f32.xlu1 %v1801_v43  ;;  %3303 = vpow2.f32 %v1779_v18 }
 0x7e7   : > { %3305 = vpow2.f32 %v1787_v20 }
 0x7e8   : > { %v3294_v47 = vpop.eup %3293 }
 0x7e9   : > { %v1804_v52 = vsel %vm592_vm3, %v3294_v47, 0.0 }
 0x7ea   : > { %1805 = vadd.xlane.f32.xlu0 %v1804_v52 }
 0x7ec   : > { %v3809_v53 = vpop.eup %3295 }
 0x7ed   : > { %v1813_v45 = vsel %vm592_vm3, %v3809_v53, 0.0 }
 0x7ee   : > { %1814 = vadd.xlane.f32.xlu1 %v1813_v45 }
 0x7f0   : > { %v3813_v48 = vpop.eup %3297 }
 0x7f1   : > { %v1816_v49 = vsel %vm592_vm3, %v3813_v48, 0.0  ;;  %v3817_v63 = vpop.eup %3299 }
 0x7f2   : > { %1817 = vadd.xlane.f32.xlu0 %v1816_v49  ;;  %v1798_v5 = vsel %vm592_vm3, %v3817_v63, 0.0  ;;  %v3821_v15 = vpop.eup %3301 }
 0x7f3   : > { %v1810_v16 = vsel %vm592_vm3, %v3821_v15, 0.0  ;;  %v3304_v22 = vpop.eup %3303 }
 0x7f4   : > { %v1795_v14 = vsel %vm592_vm3, %v3304_v22, 0.0  ;;  %v3834_v23 = vpop.eup %3305 }
 0x7f5   : > { %v1807_v25 = vsel %vm592_vm3, %v3834_v23, 0.0 }
 0x7f6   : > { %1799 = vadd.xlane.f32.xlu0 %v1798_v5 }
 0x7fa   : > { %1811 = vadd.xlane.f32.xlu0 %v1810_v16 }
 0x7ff   : > { %1839 = vrot.lane.b32.xlu1 %v3446_v21, %s3374_s27 }
 0x810   : > { %1886 = vrot.lane.b32.xlu0 %v3454_v26, %s3374_s27 }
 0x814   : > { %2123 = vrot.lane.b32.xlu0 %v3446_v21, %s3375_s28 }
 0x818   : > { %2180 = vrot.lane.b32.xlu0 %v3454_v26, %s3375_s28 }
 0x81c   : > { %2178 = vrot.lane.b32.xlu0 %v3454_v26, %s3376_s29 }
 0x820   : > { %2229 = vrot.lane.b32.xlu0 %v3448_v24, %s3376_s29 }
 0x823   : > { %1796 = vadd.xlane.f32.xlu1 %v1795_v14 }
 0x824   : > { %2125 = vrot.lane.b32.xlu0 %v3355_v8, %s3373_s20 }
 0x827   : > { %1808 = vadd.xlane.f32.xlu1 %v1807_v25 }
 0x838   : > { %1933 = vrot.lane.b32.xlu1 %v3448_v24, %s3374_s27 }
 0x83c   : > { %1980 = vrot.lane.b32.xlu1 %v3456_v27, %s3374_s27 }
 0x840   : > { %2121 = vrot.lane.b32.xlu1 %v3446_v21, %s3376_s29 }
 0x844   : > { %2231 = vrot.lane.b32.xlu1 %v3448_v24, %s3375_s28 }
 0x848   : > { %2282 = vrot.lane.b32.xlu1 %v3456_v27, %s3375_s28 }
 0x84c   : > { %2280 = vrot.lane.b32.xlu1 %v3456_v27, %s3376_s29 }
 0x850   : > { %2127 = vrot.lane.b32.xlu1 %v3356_v28, %s3373_s20  ;;  %v2837_v28 = vld [vmem:[%s4028_s4 + $0x8] sm:$0xf]  ;;  %s253_s20 = scalar_lea.vmem %s4030_s6, %s2792_s15 }
 0x86f   : > { %v1803_v29 = vpop.xlane.xlu1 %1802 }
 0x873   : > { %v1806_v30 = vpop.xlane.xlu0 %1805 }
 0x874   : > { %3307 = vrcp.f32 %v1806_v30 }
 0x875   : > { %3309 = vrcp.f32 %v1803_v29  ;;  %v2046_v29 = vsel %vm1388_vm4, %v2837_v28, 0 }
 0x877   : > { %v1815_v31 = vpop.xlane.xlu1 %1814 }
 0x87b   : > { %v1840_v32 = vpop.permute.xlu1 %1839  ;;  %v1818_v33 = vpop.xlane.xlu0 %1817 }
 0x87c   : > { %3101 = vmatpush3.bf16.msra.mxu0 %v1840_v32  ;;  %3311 = vrcp.f32 %v1818_v33 }
 0x87d   : > { %3112 = vmatprep.subr.bf16.mxu0 %v3365_v6  ;;  %3313 = vrcp.f32 %v1815_v31 }
 0x87f   : > { %v1800_v34 = vpop.xlane.xlu0 %1799 }
 0x880   : > { %3315 = vrcp.f32 %v1800_v34 }
 0x881   : > { %v3308_v35 = vpop.eup %3307 }
 0x882   : > { %v3310_v46 = vpop.eup %3309  ;;  %v1830_v54 = vmul.f32 %v3308_v35, %v3294_v47 }
 0x883   : > { %v1812_v37 = vpop.xlane.xlu0 %1811  ;;  %v1829_v58 = vmul.f32 %v3310_v46, %v3804_v39 }
 0x885   : > { %v1836_v59 = vpack.c.bf16 %v1830_v54, %v1829_v58 }
 0x887   : > { %v1887_v56 = vpop.permute.xlu0 %1886 }
 0x888   : > { %3107 = vmatpush3.bf16.msra.mxu1 %v1887_v56 }
 0x889   : > { %3118 = vmatprep.subr.bf16.mxu1 %v3365_v6  ;;  %v3312_v57 = vpop.eup %3311 }
 0x88a   : > { %v3314_v62 = vpop.eup %3313  ;;  %v1834_v12 = vmul.f32 %v3312_v57, %v3813_v48 }
 0x88b   : > { %3109 = vmatmul.mubr.msk.bf16.vlgmr.msra.gmra.mxu1 %vm592_vm3, %v1836_v59  ;;  %v1833_v41 = vmul.f32 %v3314_v62, %v3809_v53  ;;  %v2124_v43 = vpop.permute.xlu0 %2123 }
 0x88c   : > { %3120 = vmatprep.mubr.msk.bf16.mxu1 %vm3366_vm1, %v3365_v6  ;;  %v2135_v5 = vsel %vm394_vm2, %v2124_v43, 0 }
 0x88d   : > { %v3316_v13 = vpop.eup %3315  ;;  %v1838_v52 = vpack.c.bf16 %v1834_v12, %v1833_v41 }
 0x88e   : > { %v1828_v49 = vmul.f32 %v3316_v13, %v3817_v63 }
 0x88f   : > { %v2181_v63 = vpop.permute.xlu0 %2180 }
 0x893   : > { %v2179_v25 = vpop.permute.xlu0 %2178 }
 0x897   : > { %v2230_v35 = vpop.permute.xlu0 %2229 }
 0x89b   : > { %v3892_v59 = vpop.permute.xlu0 %2125 }
 0x8ac   : > { %v1797_v60 = vpop.xlane.xlu1 %1796 }
 0x8ad   : > { %3317 = vrcp.f32 %v1797_v60 }
 0x8b0   : > { %v1809_v61 = vpop.xlane.xlu1 %1808 }
 0x8b1   : > { %3319 = vrcp.f32 %v1809_v61 }
 0x8b2   : > { %3321 = vrcp.f32 %v1812_v37 }
 0x8b4   : > { %v1934_v0 = vpop.permute.xlu1 %1933 }
 0x8b8   : > { %v1981_v39 = vpop.permute.xlu1 %1980 }
 0x8b9   : > { %3119 = vmatpush3.bf16.msra.mxu1 %v1981_v39 }
 0x8ba   : > { %v3318_v47 = vpop.eup %3317  ;;  %3134 = vmatprep.subr.bf16.mxu1 %v3365_v6 }
 0x8bb   : > { %v1827_v45 = vmul.f32 %v3318_v47, %v3304_v22  ;;  %v2186_v22 = vsel %vm394_vm2, %v2181_v63, 0 }
 0x8bc   : > { %3121 = vmatmul.mubr.msk.bf16.vlgmr.msra.gmra.mxu1 %vm592_vm3, %v1838_v52  ;;  %v2122_v16 = vpop.permute.xlu1 %2121 }
 0x8bd   : > { %3135 = vmatpush3.bf16.xpose.msra.mxu1 %v2135_v5  ;;  %v1835_v48 = vpack.c.bf16 %v1828_v49, %v1827_v45  ;;  %3136 = vmatprep.mubr.msk.bf16.mxu1 %vm3366_vm1, %v3365_v6 }
 0x8be   : > { %v3320_v53 = vpop.eup %3319  ;;  %3140 = vmatprep.subr.bf16.mxu1 %v3365_v6 }
 0x8bf   : > { %3103 = vmatmul.mubr.msk.bf16.vlgmr.msra.gmra.mxu0 %vm592_vm3, %v1835_v48  ;;  %v3322_v17 = vpop.eup %3321  ;;  %v1831_v18 = vmul.f32 %v3320_v53, %v3834_v23 }
 0x8c0   : > { %3113 = vmatpush3.bf16.msra.mxu0 %v1934_v0  ;;  %3114 = vmatprep.mubr.msk.bf16.mxu0 %vm3366_vm1, %v3365_v6  ;;  %v2232_v19 = vpop.permute.xlu1 %2231  ;;  %v1832_v20 = vmul.f32 %v3322_v17, %v3821_v15 }
 0x8c1   : > { %3198 = vmatprep.subr.msk.bf16.mxu0 %vm1388_vm4, %v2837_v28  ;;  %v2237_v41 = vsel %vm394_vm2, %v2232_v19, 0 }
 0x8c2   : > { %v1837_v14 = vpack.c.bf16 %v1832_v20, %v1831_v18 }
 0x8c4   : > { %3137 = vmatmul.mubr.msk.bf16.vlgmr.msra.gmra.mxu1 %vm394_vm2, %v2122_v16  ;;  %v2283_v8 = vpop.permute.xlu1 %2282 }
 0x8c5   : > { %3141 = vmatpush3.bf16.xpose.msra.mxu1 %v2186_v22  ;;  %3142 = vmatprep.mubr.msk.bf16.mxu1 %vm3366_vm1, %v3365_v6  ;;  %v2288_v23 = vsel %vm394_vm2, %v2283_v8, 0 }
 0x8c6   : > { %3152 = vmatprep.subr.bf16.mxu1 %v3365_v6 }
 0x8c7   : > { %3115 = vmatmul.mubr.msk.bf16.vlgmr.msra.gmra.mxu0 %vm592_vm3, %v1837_v14 }
 0x8c8   : > { %v2281_v15 = vpop.permute.xlu1 %2280  ;;  %3125 = vmatpush3.bf16.msra.mxu0 %v2046_v29 }
 0x8c9   : > { %3146 = vmatprep.subr.bf16.mxu0 %v3365_v6 }
 0x8cc   : > { %3143 = vmatmul.mubr.msk.bf16.vlgmr.msra.gmra.mxu1 %vm394_vm2, %v2179_v25  ;;  %v3896_v39 = vpop.permute.xlu1 %2127 }
 0x8cd   : > { %3153 = vmatpush3.bf16.xpose.msra.mxu1 %v2288_v23  ;;  %3154 = vmatprep.mubr.msk.bf16.mxu1 %vm3366_vm1, %v3365_v6 }
 0x8ce   : > { %3164 = vmatprep.subr.bf16.mxu1 %v3365_v6 }
 0x8d4   : > { %3155 = vmatmul.mubr.msk.bf16.vlgmr.msra.gmra.mxu1 %vm394_vm2, %v2281_v15 }
 0x8d5   : > { %3166 = vmatprep.mubr.msk.bf16.mxu1 %vm3366_vm1, %v3365_v6 }
 0x94b   : > { %v1926_v30 = vpop.f32.mrf.mxu1 }
 0x94d   : > { %v3110_v31 = vpop.f32.mrf.mxu1 }
 0x94f   : > { %v1929_v32 = vpop.f32.mrf.mxu1 }
 0x950   : > { %v2028_v0 = vpack.c.bf16 %v1929_v32, %v1926_v30  ;;  %v1515_v32 = vadd.f32 %v3748_v38, %v3774_v1 }
 0x951   : > { %v3111_v33 = vpop.f32.mrf.mxu1 }
 0x97c   : > { %v2020_v34 = vpop.f32.mrf.mxu1 }
 0x97e   : > { %v3122_v37 = vpop.f32.mrf.mxu1 }
 0x97f   : > { %v1879_v46 = vpop.f32.mrf.mxu0 }
 0x980   : > { %v2023_v54 = vpop.f32.mrf.mxu1 }
 0x981   : > { %v3104_v56 = vpop.f32.mrf.mxu0  ;;  %v2030_v63 = vpack.c.bf16 %v2023_v54, %v2020_v34  ;;  %v1507_v34 = vadd.f32 %v3752_v40, %v3776_v2  ;;  %v1531_v40 = vadd.f32 %v3760_v50, %v3782_v7 }
 0x982   : > { %v3123_v58 = vpop.f32.mrf.mxu1 }
 0x983   : > { %v1882_v60 = vpop.f32.mrf.mxu0 }
 0x984   : > { %v2027_v61 = vpack.c.bf16 %v1882_v60, %v1879_v46  ;;  %v2171_v57 = vpop.f32.mrf.mxu1 }
 0x985   : > { %v3105_v62 = vpop.f32.mrf.mxu0  ;;  %v2172_v12 = vadd.f32 %v2171_v57, %v3892_v59  ;;  %v1510_v57 = vadd.f32 %v3756_v42, %v3780_v4  ;;  %v1534_v42 = vadd.f32 %v3767_v51, %v3786_v10 }
 0x986   : > { %3126 = vmatprep.mubr.msk.bf16.mxu0 %vm394_vm2, %v2027_v61  ;;  %v3138_v13 = vpop.f32.mrf.mxu1 }
 0x987   : > { %v1973_v43 = vpop.f32.mrf.mxu0  ;;  %3127 = vmatmul.mubr.msk.bf16.vlgmr.msra.gmra.mxu0 %vm394_vm2, %v2028_v0  ;;  %v2331_v47 = vsel %vm592_vm3, %v2172_v12, -inf }
 0x988   : > { %3147 = vmatpush3.bf16.xpose.msra.mxu0 %v2237_v41  ;;  %v2174_v52 = vpop.f32.mrf.mxu1  ;;  %2332 = vmax.xlane.f32.xlu0 %v2331_v47 }
 0x989   : > { %v2175_v45 = vadd.f32 %v2174_v52, %v3896_v39  ;;  %v3116_v49 = vpop.f32.mrf.mxu0  ;;  %3158 = vmatprep.subr.bf16.mxu0 %v3365_v6 }
 0x98a   : > { %v3139_v5 = vpop.f32.mrf.mxu1 }
 0x98b   : > { %v1976_v16 = vpop.f32.mrf.mxu0  ;;  %v2334_v48 = vsel %vm592_vm3, %v2175_v45, -inf }
 0x98c   : > { %v2029_v53 = vpack.c.bf16 %v1976_v16, %v1973_v43  ;;  %2335 = vmax.xlane.f32.xlu1 %v2334_v48  ;;  %v2222_v17 = vpop.f32.mrf.mxu1 }
 0x98d   : > { %v2223_v18 = vadd.f32 %v2222_v17, %v3892_v59  ;;  %v3117_v19 = vpop.f32.mrf.mxu0 }
 0x98e   : > { %3130 = vmatprep.mubr.msk.bf16.mxu0 %vm394_vm2, %v2029_v53  ;;  %v3144_v20 = vpop.f32.mrf.mxu1 }
 0x98f   : > { %3131 = vmatmul.mubr.msk.bf16.gmra.mxu0 %vm394_vm2, %v2030_v63  ;;  %v2337_v22 = vsel %vm592_vm3, %v2223_v18, -inf }
 0x990   : > { %v2225_v14 = vpop.f32.mrf.mxu1  ;;  %2338 = vmax.xlane.f32.xlu0 %v2337_v22  ;;  %3148 = vmatprep.mubr.msk.bf16.mxu0 %vm3366_vm1, %v3365_v6 }
 0x991   : > { %v2226_v8 = vadd.f32 %v2225_v14, %v3896_v39 }
 0x992   : > { %v3145_v25 = vpop.f32.mrf.mxu1 }
 0x993   : > { %v2340_v23 = vsel %vm592_vm3, %v2226_v8, -inf }
 0x994   : > { %v2324_v15 = vpop.f32.mrf.mxu1  ;;  %2341 = vmax.xlane.f32.xlu0 %v2340_v23 }
 0x995   : > { %v2325_v48 = vadd.f32 %v2324_v15, %v3892_v59 }
 0x996   : > { %v3156_v28 = vpop.f32.mrf.mxu1 }
 0x997   : > { %3149 = vmatmul.mubr.msk.bf16.vlgmr.msra.gmra.mxu0 %vm394_vm2, %v2230_v35  ;;  %v1518_v35 = vadd.f32 %v3754_v44, %v3778_v3 }
 0x998   : > { %v2327_v29 = vpop.f32.mrf.mxu1  ;;  %3160 = vmatprep.mubr.msk.bf16.mxu0 %vm3366_vm1, %v3365_v6 }
 0x999   : > { %v2328_v63 = vadd.f32 %v2327_v29, %v3896_v39 }
 0x99a   : > { %v3157_v30 = vpop.f32.mrf.mxu1 }
 0xa11   : > { %v2333_v31 = vpop.xlane.xlu0 %2332 }
 0xa12   : > { %v2355_v56 = vsub.f32 %v2172_v12, %v2333_v31  ;;  %v1523_v12 = vadd.f32 %v3765_v36, %v3784_v9 }
 0xa14   : > { %v2363_v2 = vmul.f32 1.442695, %v2355_v56 }
 0xa15   : > { %v2336_v58 = vpop.xlane.xlu1 %2335 }
 0xa16   : > { %v2356_v1 = vsub.f32 %v2175_v45, %v2336_v58  ;;  %3323 = vpow2.f32 %v2363_v2  ;;  %v1526_v45 = vadd.f32 %v3769_v55, %v3788_v11 }
 0xa18   : > { %v2365_v4 = vmul.f32 1.442695, %v2356_v1 }
 0xa19   : > { %v2339_v46 = vpop.xlane.xlu0 %2338 }
 0xa1a   : > { %v2357_v62 = vsub.f32 %v2223_v18, %v2339_v46  ;;  %3325 = vpow2.f32 %v2365_v4  ;;  %v2349_v18 = vsel %vm592_vm3, %v2325_v48, -inf }
 0xa1c   : > { %v2367_v47 = vmul.f32 1.442695, %v2357_v62 }
 0xa1d   : > { %v2342_v44 = vpop.xlane.xlu0 %2341 }
 0xa1e   : > { %v2358_v52 = vsub.f32 %v2226_v8, %v2342_v44  ;;  %3327 = vpow2.f32 %v2367_v47 }
 0xa20   : > { %v2369_v9 = vmul.f32 1.442695, %v2358_v52 }
 0xa22   : > { %3329 = vpow2.f32 %v2369_v9 }
 0xa23   : > { %v3954_v20 = vpop.eup %3323 }
 0xa24   : > { %v2379_v14 = vsel %vm592_vm3, %v3954_v20, 0.0 }
 0xa27   : > { %v3326_v22 = vpop.eup %3325 }
 0xa2b   : > { %v3959_v8 = vpop.eup %3327 }
 0xa2c   : > { %v2385_v25 = vsel %vm592_vm3, %v3959_v8, 0.0 }
 0xa2f   : > { %v3330_v23 = vpop.eup %3329 }
 0xa30   : > { %v2388_v15 = vsel %vm592_vm3, %v3330_v23, 0.0 }
 0xa47   : > { %v3128_v33 = vpop.f32.mrf.mxu0 }
 0xa48   : > { %v3919_v37 = vadd.f32 %v3128_v33, %v1515_v32 }
 0xa49   : > { %v2082_v54 = vpop.f32.mrf.mxu0 }
 0xa4a   : > { %v3923_v60 = vadd.f32 %v2082_v54, %v1507_v34 }
 0xa4b   : > { %v3129_v61 = vpop.f32.mrf.mxu0 }
 0xa4c   : > { %v3927_v38 = vadd.f32 %v3129_v61, %v1518_v35 }
 0xa4d   : > { %v2085_v0 = vpop.f32.mrf.mxu0 }
 0xa4e   : > { %v3931_v13 = vadd.f32 %v2085_v0, %v1510_v57 }
 0xa4f   : > { %v3132_v3 = vpop.f32.mrf.mxu0 }
 0xa50   : > { %v3935_v41 = vadd.f32 %v3132_v3, %v1531_v40 }
 0xa51   : > { %v2098_v43 = vpop.f32.mrf.mxu0 }
 0xa52   : > { %v3939_v50 = vadd.f32 %v2098_v43, %v1523_v12 }
 0xa53   : > { %v3133_v7 = vpop.f32.mrf.mxu0 }
 0xa54   : > { %v3943_v49 = vadd.f32 %v3133_v7, %v1534_v42 }
 0xa55   : > { %v2101_v36 = vpop.f32.mrf.mxu0 }
 0xa56   : > { %v3945_v5 = vadd.f32 %v2101_v36, %v1526_v45 }
 0xa57   : > { %v2273_v51 = vpop.f32.mrf.mxu0 }
 0xa58   : > { %v2274_v10 = vadd.f32 %v2273_v51, %v3892_v59  ;;  %v2352_v59 = vsel %vm592_vm3, %v2328_v63, -inf }
 0xa59   : > { %v3150_v16 = vpop.f32.mrf.mxu0 }
 0xa5a   : > { %v2343_v53 = vsel %vm592_vm3, %v2274_v10, -inf }
 0xa5b   : > { %v2276_v17 = vpop.f32.mrf.mxu0  ;;  %2344 = vmax.xlane.f32.xlu1 %v2343_v53 }
 0xa5c   : > { %v2277_v55 = vadd.f32 %v2276_v17, %v3896_v39  ;;  %v2382_v39 = vsel %vm592_vm3, %v3326_v22, 0.0 }
 0xa5d   : > { %v3151_v11 = vpop.f32.mrf.mxu0 }
 0xa5e   : > { %v2346_v19 = vsel %vm592_vm3, %v2277_v55, -inf }
 0xa5f   : > { %2350 = vmax.xlane.f32.xlu1 %v2349_v18  ;;  %2347 = vmax.xlane.f32.xlu0 %v2346_v19 }
 0xa63   : > { %2353 = vmax.xlane.f32.xlu0 %v2352_v59  ;;  %2380 = vadd.xlane.f32.xlu1 %v2379_v14 }
 0xa67   : > { %2383 = vadd.xlane.f32.xlu0 %v2382_v39  ;;  %2386 = vadd.xlane.f32.xlu1 %v2385_v25  ;;  %v2850_v39 = vld [vmem:[%s4028_s4 + $0xc] sm:$0xf] }
 0xa68   : > { %v2630_v25 = vsel %vm1388_vm4, %v2850_v39, 0 }
 0xa6b   : > { %2389 = vadd.xlane.f32.xlu0 %v2388_v15 }
 0xae4   : > { %v2345_v28 = vpop.xlane.xlu1 %2344 }
 0xae5   : > { %v2359_v40 = vsub.f32 %v2274_v10, %v2345_v28 }
 0xae7   : > { %v2371_v2 = vmul.f32 1.442695, %v2359_v40 }
 0xae8   : > { %v2351_v29 = vpop.xlane.xlu1 %2350  ;;  %v2348_v30 = vpop.xlane.xlu0 %2347 }
 0xae9   : > { %v2361_v31 = vsub.f32 %v2325_v48, %v2351_v29  ;;  %v2360_v33 = vsub.f32 %v2277_v55, %v2348_v30 }
 0xaeb   : > { %v2375_v32 = vmul.f32 1.442695, %v2361_v31  ;;  %v2373_v54 = vmul.f32 1.442695, %v2360_v33 }
 0xaec   : > { %v2354_v34 = vpop.xlane.xlu0 %2353  ;;  %v2381_v12 = vpop.xlane.xlu1 %2380 }
 0xaed   : > { %3331 = vpow2.f32 %v2375_v32  ;;  %v2362_v46 = vsub.f32 %v2328_v63, %v2354_v34 }
 0xaef   : > { %v2377_v35 = vmul.f32 1.442695, %v2362_v46 }
 0xaf0   : > { %v2384_v3 = vpop.xlane.xlu0 %2383  ;;  %v2387_v4 = vpop.xlane.xlu1 %2386 }
 0xaf1   : > { %3333 = vpow2.f32 %v2377_v35 }
 0xaf2   : > { %3335 = vpow2.f32 %v2373_v54 }
 0xaf3   : > { %3337 = vpow2.f32 %v2371_v2 }
 0xaf4   : > { %3339 = vrcp.f32 %v2384_v3  ;;  %v2390_v42 = vpop.xlane.xlu0 %2389 }
 0xaf5   : > { %3341 = vrcp.f32 %v2381_v12 }
 0xaf6   : > { %3343 = vrcp.f32 %v2390_v42 }
 0xaf7   : > { %3345 = vrcp.f32 %v2387_v4 }
 0xafa   : > { %v3332_v56 = vpop.eup %3331 }
 0xafb   : > { %v2397_v58 = vsel %vm592_vm3, %v3332_v56, 0.0 }
 0xafc   : > { %2398 = vadd.xlane.f32.xlu1 %v2397_v58 }
 0xafe   : > { %v3334_v61 = vpop.eup %3333 }
 0xaff   : > { %v2400_v57 = vsel %vm592_vm3, %v3334_v61, 0.0  ;;  %v3967_v1 = vpop.eup %3335 }
 0xb00   : > { %2401 = vadd.xlane.f32.xlu0 %v2400_v57  ;;  %v2394_v0 = vsel %vm592_vm3, %v3967_v1, 0.0  ;;  %v3338_v62 = vpop.eup %3337 }
 0xb01   : > { %v2391_v44 = vsel %vm592_vm3, %v3338_v62, 0.0 }
 0xb04   : > { %2395 = vadd.xlane.f32.xlu0 %v2394_v0 }
 0xb0d   : > { %2423 = vrot.lane.b32.xlu1 %v3446_v21, %s3377_s12  ;;  %v3340_v21 = vpop.eup %3339 }
 0xb0e   : > { %v3342_v43 = vpop.eup %3341  ;;  %v2412_v47 = vmul.f32 %v3340_v21, %v3326_v22 }
 0xb0f   : > { %v2411_v45 = vmul.f32 %v3342_v43, %v3954_v20 }
 0xb1a   : > { %2470 = vrot.lane.b32.xlu0 %v3454_v26, %s3377_s12 }
 0xb31   : > { %2392 = vadd.xlane.f32.xlu1 %v2391_v44  ;;  %v2855_v44 = vld [vmem:[%s4029_s5] ss:$0 sm:$0xff] }
 0xb42   : > { %2517 = vrot.lane.b32.xlu1 %v3448_v24, %s3377_s12  ;;  %v2419_v24 = vpack.c.bf16 %v2412_v47, %v2411_v45 }
 0xb46   : > { %2564 = vrot.lane.b32.xlu1 %v3456_v27, %s3377_s12  ;;  %v3344_v27 = vpop.eup %3343 }
 0xb47   : > { %v3346_v9 = vpop.eup %3345  ;;  %v2414_v51 = vmul.f32 %v3344_v27, %v3330_v23 }
 0xb48   : > { %v2413_v16 = vmul.f32 %v3346_v9, %v3959_v8 }
 0xb4a   : > { %v2420_v48 = vpack.c.bf16 %v2414_v51, %v2413_v16 }
 0xb85   : > { %v2399_v26 = vpop.xlane.xlu1 %2398 }
 0xb89   : > { %v2424_v52 = vpop.permute.xlu1 %2423  ;;  %v2402_v7 = vpop.xlane.xlu0 %2401 }
 0xb8a   : > { %3159 = vmatpush3.bf16.msra.mxu0 %v2424_v52  ;;  %3347 = vrcp.f32 %v2402_v7 }
 0xb8b   : > { %3170 = vmatprep.subr.bf16.mxu0 %v3365_v6  ;;  %3349 = vrcp.f32 %v2399_v26 }
 0xb8d   : > { %3161 = vmatmul.mubr.msk.bf16.vlgmr.msra.gmra.mxu0 %vm592_vm3, %v2419_v24  ;;  %v2396_v36 = vpop.xlane.xlu0 %2395 }
 0xb8e   : > { %3172 = vmatprep.mubr.msk.bf16.mxu0 %vm3366_vm1, %v3365_v6  ;;  %3351 = vrcp.f32 %v2396_v36 }
 0xb91   : > { %v2471_v10 = vpop.permute.xlu0 %2470 }
 0xb92   : > { %3165 = vmatpush3.bf16.msra.mxu1 %v2471_v10 }
 0xb93   : > { %3176 = vmatprep.subr.bf16.mxu1 %v3365_v6 }
 0xb95   : > { %3167 = vmatmul.mubr.msk.bf16.vlgmr.msra.gmra.mxu1 %vm592_vm3, %v2420_v48 }
 0xb96   : > { %3178 = vmatprep.mubr.msk.bf16.mxu1 %vm3366_vm1, %v3365_v6 }
 0xb97   : > { %v3348_v17 = vpop.eup %3347 }
 0xb98   : > { %v3350_v11 = vpop.eup %3349  ;;  %v2418_v63 = vmul.f32 %v3348_v17, %v3334_v61 }
 0xb99   : > { %v2417_v19 = vmul.f32 %v3350_v11, %v3332_v56 }
 0xb9b   : > { %v2422_v20 = vpack.c.bf16 %v2418_v63, %v2417_v19  ;;  %v3352_v22 = vpop.eup %3351 }
 0xb9c   : > { %v2416_v6 = vmul.f32 %v3352_v22, %v3967_v1 }
 0xbba   : > { %v2393_v53 = vpop.xlane.xlu1 %2392 }
 0xbbb   : > { %3353 = vrcp.f32 %v2393_v53 }
 0xbbe   : > { %v2518_v55 = vpop.permute.xlu1 %2517 }
 0xbbf   : > { %3171 = vmatpush3.bf16.msra.mxu0 %v2518_v55 }
 0xbc0   : > { %3199 = vmatprep.subr.msk.bf16.mxu0 %vm1388_vm4, %v2850_v39 }
 0xbc2   : > { %v2565_v18 = vpop.permute.xlu1 %2564 }
 0xbc3   : > { %3177 = vmatpush3.bf16.msra.mxu1 %v2565_v18 }
 0xbc6   : > { %3179 = vmatmul.mubr.msk.bf16.vlgmr.msra.gmra.mxu1 %vm592_vm3, %v2422_v20 }
 0xbc8   : > { %v3354_v59 = vpop.eup %3353 }
 0xbc9   : > { %v2415_v14 = vmul.f32 %v3354_v59, %v3338_v62 }
 0xbcb   : > { %v2421_v8 = vpack.c.bf16 %v2416_v6, %v2415_v14 }
 0xbcd   : > { %3173 = vmatmul.mubr.msk.bf16.vlgmr.msra.gmra.mxu0 %vm592_vm3, %v2421_v8 }
 0xbce   : > { %3183 = vmatpush3.bf16.msra.mxu0 %v2630_v25 }
 0xc4d   : > { %v2463_v23 = vpop.f32.mrf.mxu0 }
 0xc4f   : > { %v3162_v15 = vpop.f32.mrf.mxu0 }
 0xc51   : > { %v2466_v28 = vpop.f32.mrf.mxu0 }
 0xc52   : > { %v2611_v29 = vpack.c.bf16 %v2466_v28, %v2463_v23 }
 0xc53   : > { %v3163_v30 = vpop.f32.mrf.mxu0 }
 0xc54   : > { %3184 = vmatprep.mubr.msk.bf16.mxu0 %vm394_vm2, %v2611_v29 }
 0xc55   : > { %v2510_v31 = vpop.f32.mrf.mxu1 }
 0xc57   : > { %v3168_v32 = vpop.f32.mrf.mxu1 }
 0xc59   : > { %v2513_v33 = vpop.f32.mrf.mxu1 }
 0xc5a   : > { %v2612_v34 = vpack.c.bf16 %v2513_v33, %v2510_v31 }
 0xc5b   : > { %v3169_v46 = vpop.f32.mrf.mxu1 }
 0xc5c   : > { %3185 = vmatmul.mubr.msk.bf16.vlgmr.msra.gmra.mxu0 %vm394_vm2, %v2612_v34 }
 0xc86   : > { %v2604_v54 = vpop.f32.mrf.mxu1 }
 0xc88   : > { %v3180_v35 = vpop.f32.mrf.mxu1 }
 0xc8a   : > { %v2607_v56 = vpop.f32.mrf.mxu1 }
 0xc8b   : > { %v2614_v40 = vpack.c.bf16 %v2607_v56, %v2604_v54 }
 0xc8c   : > { %v3181_v58 = vpop.f32.mrf.mxu1 }
 0xc8d   : > { %v2557_v61 = vpop.f32.mrf.mxu0 }
 0xc8f   : > { %v3174_v57 = vpop.f32.mrf.mxu0 }
 0xc91   : > { %v2560_v1 = vpop.f32.mrf.mxu0 }
 0xc92   : > { %v2613_v0 = vpack.c.bf16 %v2560_v1, %v2557_v61 }
 0xc93   : > { %v3175_v2 = vpop.f32.mrf.mxu0 }
 0xc94   : > { %3188 = vmatprep.mubr.msk.bf16.mxu0 %vm394_vm2, %v2613_v0 }
 0xc95   : > { %3189 = vmatmul.mubr.msk.bf16.gmra.mxu0 %vm394_vm2, %v2614_v40 }
 0xd1c   : > { %v3186_v62 = vpop.f32.mrf.mxu0 }
 0xd1d   : > { %v2699_v3 = vadd.f32 %v3186_v62, %v3919_v37 }
 0xd1e   : > { %v2666_v12 = vpop.f32.mrf.mxu0 }
 0xd1f   : > { %v2714_v42 = vadd.f32 %v2855_v44, %v2699_v3  ;;  %v2697_v4 = vadd.f32 %v2666_v12, %v3923_v60 }
 0xd20   : > { %v3187_v21 = vpop.f32.mrf.mxu0 }
 0xd21   : > { %2722 = vst.msk [vmem:[%s253_s20 + $0x10] sm:$0xff] %vm307_vm0, %v2714_v42  ;;  %v2712_v26 = vadd.f32 %v2855_v44, %v2697_v4  ;;  %v2700_v43 = vadd.f32 %v3187_v21, %v3927_v38 }
 0xd22   : > { %v2669_v47 = vpop.f32.mrf.mxu0 }
 0xd23   : > { %2720 = vst.msk [vmem:[%s253_s20] sm:$0xff] %vm307_vm0, %v2712_v26  ;;  %v2715_v52 = vadd.f32 %v2855_v44, %v2700_v43  ;;  %v2698_v37 = vadd.f32 %v2669_v47, %v3931_v13 }
 0xd25   : > { %2723 = vst.msk [vmem:[%s253_s20 + $0x18] sm:$0xff] %vm307_vm0, %v2715_v52  ;;  %v2713_v7 = vadd.f32 %v2855_v44, %v2698_v37 }
 0xd27   : > { %2721 = vst.msk [vmem:[%s253_s20 + $0x8] sm:$0xff] %vm307_vm0, %v2713_v7 }
 0xd55   : > { %v3190_v45 = vpop.f32.mrf.mxu0 }
 0xd56   : > { %v2703_v60 = vadd.f32 %v3190_v45, %v3935_v41 }
 0xd57   : > { %v2682_v24 = vpop.f32.mrf.mxu0 }
 0xd58   : > { %v2718_v27 = vadd.f32 %v2855_v44, %v2703_v60  ;;  %v2701_v36 = vadd.f32 %v2682_v24, %v3939_v50 }
 0xd59   : > { %v3191_v9 = vpop.f32.mrf.mxu0 }
 0xd5a   : > { %2726 = vst.msk [vmem:[%s253_s20 + $0x30] sm:$0xff] %vm307_vm0, %v2718_v27  ;;  %v2716_v38 = vadd.f32 %v2855_v44, %v2701_v36  ;;  %v2704_v51 = vadd.f32 %v3191_v9, %v3943_v49 }
 0xd5b   : > { %v2685_v10 = vpop.f32.mrf.mxu0 }
 0xd5c   : > { %2724 = vst.msk [vmem:[%s253_s20 + $0x20] sm:$0xff] %vm307_vm0, %v2716_v38  ;;  %v2719_v13 = vadd.f32 %v2855_v44, %v2704_v51  ;;  %v2702_v16 = vadd.f32 %v2685_v10, %v3945_v5 }
 0xd5e   : > { %2727 = vst.msk [vmem:[%s253_s20 + $0x38] sm:$0xff] %vm307_vm0, %v2719_v13  ;;  %v2717_v48 = vadd.f32 %v2855_v44, %v2702_v16 }
 0xd60   : > { %2725 = vst.msk [vmem:[%s253_s20 + $0x28] sm:$0xff] %vm307_vm0, %v2717_v48 }
 0xd61 PF: > { %s16_s21 = sadd.s32 1, %s3363_s21  }
 0xd62   : > { %p13_p4 = scmp.ge.s32.totalorder %s16_s21, 4  }
 0xd64   :  { %15 = sbr.rel (!%p13_p4) target bundleno = 1 (0x1), region = 77 }

</bundles_post_ra>
